<compile_context>
chip_gen: v5e
topology: v5e:2x2
jax: 0.10.0
libtpu: 0.0.40
codegen_flags: <defaults>
</compile_context>

<pallas_src>
import jax
import jax.numpy as jnp
import numpy as np
from jax import lax
from jax.experimental import pallas as pl
from jax.experimental.pallas import tpu as pltpu


# (p, d) -> kernel tap index k for ConvTranspose2d(k=4, s=2, p=1):
# output index o = 2*i - 1 + k; with o = 2*h + p and i = h + d  =>  k = p - 2*d + 1.
_TAP = {(0, -1): 3, (0, 0): 1, (1, 0): 2, (1, 1): 0}

# (input spatial W == H, Cin, Cout, has_bn_relu) for the 4 ConvTranspose layers.
_LAYER_GEOM = [(2, 16, 16, True), (4, 16, 16, True), (8, 16, 16, True), (16, 16, 1, False)]


# ---------------------------------------------------------------------------
# Host-side weight packing
# ---------------------------------------------------------------------------
def _build_linear(w_lin, b_lin):
    """Linear(2->64) with output columns permuted to (row, col, chan) order so the
    Reshape(-1,16,2,2) becomes two contiguous row stores inside the kernel."""
    perm = np.empty((64,), np.int64)
    for col in range(64):
        i, j, c = col // 32, (col // 16) % 2, col % 16
        perm[col] = c * 4 + i * 2 + j          # NCHW flat index of Reshape(-1,16,2,2)
    return w_lin[:, perm].astype(np.float32), b_lin[perm].reshape(1, 64).astype(np.float32)


def _build_convt_weights(w_torch, bn_scale, Ws):
    """torch ConvTranspose2d weight [Cin, Cout, 4, 4] -> [3, (Ws+2)*Cin, 4*Ws*Cout].

    Rows of each per-dh plane are indexed (w_pad, ci); columns are indexed
    (ph, w_out, pw, co) so that, with zero-padded activations,
        out = sum_dh padded_act[dh:dh+H, :] @ W[dh]
    gives out[h, ph*(2*Ws*Cout) + (2*w_out+pw)*Cout + co] = ConvT(x)[2h+ph, 2w_out+pw, co].
    The (eval-mode) BatchNorm scale is folded column-wise.
    """
    cin, cout = w_torch.shape[0], w_torch.shape[1]
    mats = np.zeros((3, (Ws + 2) * cin, 4 * Ws * cout), dtype=np.float32)
    for dh in (-1, 0, 1):
        for ph in range(2):
            kh = _TAP.get((ph, dh))
            if kh is None:
                continue
            for dw in (-1, 0, 1):
                for pw in range(2):
                    kw = _TAP.get((pw, dw))
                    if kw is None:
                        continue
                    blk = w_torch[:, :, kh, kw] * bn_scale[None, :]      # [cin, cout]
                    for w_out in range(Ws):
                        r0 = (w_out + dw + 1) * cin                       # padded width index
                        c0 = ph * (2 * Ws * cout) + (2 * w_out + pw) * cout
                        mats[dh + 1, r0:r0 + cin, c0:c0 + cout] += blk
    return mats


# ---------------------------------------------------------------------------
# Fused decoder kernel (one grid step == one batch sample)
# ---------------------------------------------------------------------------
def _decoder_kernel(h_ref, wlin_ref, blin_ref,
                    w1_ref, sh1_ref, w2_ref, sh2_ref,
                    w3_ref, sh3_ref, w4_ref, sh4_ref,
                    o_ref, p1, p2, p3, p4):
    f32 = jnp.float32

    # ---- Linear(2 -> 64); columns pre-permuted to (row, col, chan) order ----
    z = jnp.dot(h_ref[...], wlin_ref[...], preferred_element_type=f32) + blin_ref[...]

    # ---- Reshape(-1, 16, 2, 2): fill the padded layer-1 activation scratch ----
    # p1[1+h, (1+w)*16 + c] = x[c, h, w]; border rows/cols stay zero (= conv padding).
    p1[...] = jnp.zeros_like(p1)
    p1[1:2, 16:48] = z[:, 0:32]
    p1[2:3, 16:48] = z[:, 32:64]

    def conv_layer(in_p, Ws, cin, cout, w_ref, sh_ref, relu, out_p):
        Hs = Ws
        half = 2 * Ws * cout
        # 3 accumulating matmuls: one per vertical tap (dh = -1, 0, +1).
        acc = jnp.dot(in_p[0:Hs, :], w_ref[0], preferred_element_type=f32)
        acc = acc + jnp.dot(in_p[1:1 + Hs, :], w_ref[1], preferred_element_type=f32)
        acc = acc + jnp.dot(in_p[2:2 + Hs, :], w_ref[2], preferred_element_type=f32)
        out = acc + sh_ref[...]                 # conv bias + folded BN shift
        if relu:
            out = jnp.maximum(out, 0.0)
        if out_p is None:
            return out
        # Pixel shuffle == interleaved row stores into the next padded scratch.
        out_p[...] = jnp.zeros_like(out_p)
        for hh in range(Hs):
            for ph in range(2):
                r = 1 + 2 * hh + ph
                out_p[r:r + 1, cout:cout + half] = out[hh:hh + 1, ph * half:(ph + 1) * half]
        return None

    conv_layer(p1, 2, 16, 16, w1_ref, sh1_ref, True, p2)
    conv_layer(p2, 4, 16, 16, w2_ref, sh2_ref, True, p3)
    conv_layer(p3, 8, 16, 16, w3_ref, sh3_ref, True, p4)
    out = conv_layer(p4, 16, 16, 1, w4_ref, sh4_ref, False, None)
    # out: [16, 64]; row h holds image rows (2h, 2h+1) back to back -> lane-dense store.
    o_ref[...] = out.astype(o_ref.dtype)


# ---------------------------------------------------------------------------
# Decoder module (JAX/Pallas equivalent of the PyTorch Decoder)
# ---------------------------------------------------------------------------
class Decoder:
    EPS = 1e-5  # torch BatchNorm2d default

    def __init__(self, key):
        keys = jax.random.split(key, 32)
        ki = [0]

        def nrm(shape, scale):
            k = keys[ki[0]]; ki[0] += 1
            return np.asarray(jax.random.normal(k, shape, dtype=jnp.float32)) * scale

        def uni(shape, lo, hi):
            k = keys[ki[0]]; ki[0] += 1
            return np.asarray(jax.random.uniform(k, shape, jnp.float32, lo, hi))

        # Linear(2 -> 64)
        w_lin = nrm((2, 64), 0.5)
        b_lin = nrm((64,), 0.1)
        self._lin_raw = (w_lin, b_lin)
        wlin_p, blin_p = _build_linear(w_lin, b_lin)
        self.wlin = jnp.asarray(wlin_p)
        self.blin = jnp.asarray(blin_p)

        # ConvTranspose2d stack
        self.conv_w = []
        self.conv_shift = []
        self.raw = []
        for (Ws, cin, cout, has_bn) in _LAYER_GEOM:
            w = nrm((cin, cout, 4, 4), 0.1)
            b = nrm((cout,), 0.1)
            if has_bn:
                gamma = (1.0 + nrm((cout,), 0.1)).astype(np.float32)
                beta = nrm((cout,), 0.1)
                mean = nrm((cout,), 0.1)
                var = uni((cout,), 0.5, 1.5)
                s = gamma / np.sqrt(var + self.EPS)
                t = beta - mean * s
            else:
                gamma = beta = mean = var = None
                s = np.ones((cout,), np.float32)
                t = np.zeros((cout,), np.float32)
            self.conv_w.append(jnp.asarray(_build_convt_weights(w, s, Ws)))
            shift = np.tile((b * s + t).astype(np.float32), 4 * Ws).reshape(1, 4 * Ws * cout)
            self.conv_shift.append(jnp.asarray(shift))
            self.raw.append(dict(w=w, b=b, gamma=gamma, beta=beta, mean=mean,
                                 var=var, has_bn=has_bn))

    def __call__(self, h):
        B = h.shape[0]

        def full(arr):
            nd = arr.ndim
            return pl.BlockSpec(arr.shape, lambda b, _nd=nd: (0,) * _nd)

        in_specs = [pl.BlockSpec((None, 1, 2), lambda b: (b, 0, 0)),
                    full(self.wlin), full(self.blin)]
        operands = [h.reshape(B, 1, 2).astype(jnp.float32), self.wlin, self.blin]
        for w, sh in zip(self.conv_w, self.conv_shift):
            in_specs += [full(w), full(sh)]
            operands += [w, sh]

        flops = 2 * B * sum(3 * Ws * (Ws + 2) * cin * 4 * Ws * cout
                            for (Ws, cin, cout, _) in _LAYER_GEOM)
        n_bytes = 4 * int(2 * B + B * 16 * 64 + self.wlin.size + self.blin.size
                          + sum(int(w.size) for w in self.conv_w)
                          + sum(int(s.size) for s in self.conv_shift))

        y = pl.pallas_call(
            _decoder_kernel,
            out_shape=jax.ShapeDtypeStruct((B, 16, 64), jnp.float32),
            grid=(B,),
            in_specs=in_specs,
            out_specs=pl.BlockSpec((None, 16, 64), lambda b: (b, 0, 0)),
            scratch_shapes=[
                pltpu.VMEM((4, 64), jnp.float32),    # layer-1 padded input  (2+2,  (2+2)*16)
                pltpu.VMEM((6, 96), jnp.float32),    # layer-2 padded input  (4+2,  (4+2)*16)
                pltpu.VMEM((10, 160), jnp.float32),  # layer-3 padded input  (8+2,  (8+2)*16)
                pltpu.VMEM((18, 288), jnp.float32),  # layer-4 padded input (16+2, (16+2)*16)
            ],
            compiler_params=pltpu.CompilerParams(
                dimension_semantics=("parallel",)),
            cost_estimate=pl.CostEstimate(flops=int(flops), transcendentals=0,
                                          bytes_accessed=n_bytes),
        )(*operands)
        # [B, 16, 64] -> [B, 1, 32, 32] is a free metadata reshape.
        return y.reshape(B, 1, 32, 32)


# ---------------------------------------------------------------------------
# Pure-XLA reference (independent of the sub-pixel / width-folded derivation)
# ---------------------------------------------------------------------------
def reference_decoder(h, dec: Decoder):
    w_lin, b_lin = dec._lin_raw
    z = h @ jnp.asarray(w_lin) + jnp.asarray(b_lin)
    x = z.reshape(h.shape[0], 16, 2, 2)
    for raw in dec.raw:
        w = jnp.asarray(raw["w"])                                  # [Cin, Cout, 4, 4]
        k = jnp.flip(w, (2, 3)).transpose(1, 0, 2, 3)              # OIHW, spatially flipped
        x = lax.conv_general_dilated(
            x, k, window_strides=(1, 1), padding=[(2, 2), (2, 2)],
            lhs_dilation=(2, 2),
            dimension_numbers=("NCHW", "OIHW", "NCHW"),
            precision=lax.Precision.HIGHEST,
        ) + jnp.asarray(raw["b"]).reshape(1, -1, 1, 1)
        if raw["has_bn"]:
            s = jnp.asarray(raw["gamma"]) / jnp.sqrt(jnp.asarray(raw["var"]) + Decoder.EPS)
            t = jnp.asarray(raw["beta"]) - jnp.asarray(raw["mean"]) * s
            x = x * s.reshape(1, -1, 1, 1) + t.reshape(1, -1, 1, 1)
            x = jnp.maximum(x, 0.0)
    return x


if __name__ == "__main__":
    key = jax.random.PRNGKey(0)
    k_param, k_in = jax.random.split(key)

    dec = Decoder(k_param)
    h = jax.random.normal(k_in, (2, 2), dtype=jnp.float32)   # batch=2, latent dim=2

    fwd = jax.jit(dec.__call__)
    y = fwd(h)
    jax.block_until_ready(y)

    ref = reference_decoder(h, dec)
    assert y.shape == (2, 1, 32, 32), y.shape
    assert y.dtype == jnp.float32
    max_err = float(jnp.max(jnp.abs(y - ref)))
    assert jnp.allclose(y, ref, atol=1e-3, rtol=1e-3), f"max abs err {max_err}"

    print("KERNEL_OK")
</pallas_src>

<mosaic_0001>
module attributes {stable_mosaic.version = 11 : i64} {
  func.func @_decoder_kernel(%arg0: i32, %arg1: memref<1x1x2xf32, #tpu.memory_space<vmem>>, %arg2: memref<2x64xf32, #tpu.memory_space<vmem>>, %arg3: memref<1x64xf32, #tpu.memory_space<vmem>>, %arg4: memref<3x64x128xf32, #tpu.memory_space<vmem>>, %arg5: memref<1x128xf32, #tpu.memory_space<vmem>>, %arg6: memref<3x96x256xf32, #tpu.memory_space<vmem>>, %arg7: memref<1x256xf32, #tpu.memory_space<vmem>>, %arg8: memref<3x160x512xf32, #tpu.memory_space<vmem>>, %arg9: memref<1x512xf32, #tpu.memory_space<vmem>>, %arg10: memref<3x288x64xf32, #tpu.memory_space<vmem>>, %arg11: memref<1x64xf32, #tpu.memory_space<vmem>>, %arg12: memref<1x16x64xf32, #tpu.memory_space<vmem>>, %arg13: memref<4x64xf32, #tpu.memory_space<vmem>>, %arg14: memref<6x96xf32, #tpu.memory_space<vmem>>, %arg15: memref<10x160xf32, #tpu.memory_space<vmem>>, %arg16: memref<18x288xf32, #tpu.memory_space<vmem>>) attributes {dimension_semantics = [#tpu.dimension_semantics<parallel>], iteration_bounds = array<i64: 2>, scalar_prefetch = 0 : i64, scratch_operands = 4 : i64, tpu.core_type = #tpu.core_type<tc>, window_params = [{transform_indices = @transform_0, window_bounds = array<i64: 1, 1, 2>}, {pipeline_mode = #tpu.pipeline_mode<synchronous>, transform_indices = @transform_1, window_bounds = array<i64: 2, 64>}, {pipeline_mode = #tpu.pipeline_mode<synchronous>, transform_indices = @transform_2, window_bounds = array<i64: 1, 64>}, {pipeline_mode = #tpu.pipeline_mode<synchronous>, transform_indices = @transform_3, window_bounds = array<i64: 3, 64, 128>}, {pipeline_mode = #tpu.pipeline_mode<synchronous>, transform_indices = @transform_4, window_bounds = array<i64: 1, 128>}, {pipeline_mode = #tpu.pipeline_mode<synchronous>, transform_indices = @transform_5, window_bounds = array<i64: 3, 96, 256>}, {pipeline_mode = #tpu.pipeline_mode<synchronous>, transform_indices = @transform_6, window_bounds = array<i64: 1, 256>}, {pipeline_mode = #tpu.pipeline_mode<synchronous>, transform_indices = @transform_7, window_bounds = array<i64: 3, 160, 512>}, {pipeline_mode = #tpu.pipeline_mode<synchronous>, transform_indices = @transform_8, window_bounds = array<i64: 1, 512>}, {pipeline_mode = #tpu.pipeline_mode<synchronous>, transform_indices = @transform_9, window_bounds = array<i64: 3, 288, 64>}, {pipeline_mode = #tpu.pipeline_mode<synchronous>, transform_indices = @transform_10, window_bounds = array<i64: 1, 64>}, {transform_indices = @transform_11, window_bounds = array<i64: 1, 16, 64>}]} {
    %c0 = arith.constant 0 : index
    %c0_0 = arith.constant 0 : index
    %c0_1 = arith.constant 0 : index
    %0 = vector.load %arg1[%c0, %c0_0, %c0_1] : memref<1x1x2xf32, #tpu.memory_space<vmem>>, vector<1x1x2xf32>
    %1 = vector.shape_cast %0 : vector<1x1x2xf32> to vector<1x2xf32>
    %c0_2 = arith.constant 0 : index
    %c0_3 = arith.constant 0 : index
    %2 = vector.load %arg2[%c0_2, %c0_3] : memref<2x64xf32, #tpu.memory_space<vmem>>, vector<2x64xf32>
    %cst = arith.constant dense<0.000000e+00> : vector<1x64xf32>
    %3 = tpu.matmul %1, %2, %cst {dimension_numbers = #tpu.dot_dimension_numbers<[1], [0], [0], [1], [0, 0, 1, 1], [], []>} : vector<1x2xf32>, vector<2x64xf32>, vector<1x64xf32> -> vector<1x64xf32>
    %c0_4 = arith.constant 0 : index
    %c0_5 = arith.constant 0 : index
    %4 = vector.load %arg3[%c0_4, %c0_5] : memref<1x64xf32, #tpu.memory_space<vmem>>, vector<1x64xf32>
    %5 = arith.addf %3, %4 : vector<1x64xf32>
    %cst_6 = arith.constant 0.000000e+00 : f32
    %6 = vector.broadcast %cst_6 : f32 to vector<4x64xf32>
    %c0_7 = arith.constant 0 : index
    %c0_8 = arith.constant 0 : index
    %7 = vector.load %arg13[%c0_7, %c0_8] : memref<4x64xf32, #tpu.memory_space<vmem>>, vector<4x64xf32>
    tpu.vector_store %arg13[%c0_7, %c0_8], %6 {strides = array<i32>} : memref<4x64xf32, #tpu.memory_space<vmem>>, vector<4x64xf32>,
    %8 = vector.extract_strided_slice %5 {offsets = [0, 0], sizes = [1, 32], strides = [1, 1]} : vector<1x64xf32> to vector<1x32xf32>
    %c1 = arith.constant 1 : index
    %c16 = arith.constant 16 : index
    %9 = vector.load %arg13[%c1, %c16] : memref<4x64xf32, #tpu.memory_space<vmem>>, vector<1x32xf32>
    tpu.vector_store %arg13[%c1, %c16], %8 {strides = array<i32>} : memref<4x64xf32, #tpu.memory_space<vmem>>, vector<1x32xf32>,
    %10 = vector.extract_strided_slice %5 {offsets = [0, 32], sizes = [1, 32], strides = [1, 1]} : vector<1x64xf32> to vector<1x32xf32>
    %c2 = arith.constant 2 : index
    %c16_9 = arith.constant 16 : index
    %11 = vector.load %arg13[%c2, %c16_9] : memref<4x64xf32, #tpu.memory_space<vmem>>, vector<1x32xf32>
    tpu.vector_store %arg13[%c2, %c16_9], %10 {strides = array<i32>} : memref<4x64xf32, #tpu.memory_space<vmem>>, vector<1x32xf32>,
    %c0_10 = arith.constant 0 : index
    %c0_11 = arith.constant 0 : index
    %12 = vector.load %arg13[%c0_10, %c0_11] : memref<4x64xf32, #tpu.memory_space<vmem>>, vector<2x64xf32>
    %c0_12 = arith.constant 0 : index
    %c0_13 = arith.constant 0 : index
    %c0_14 = arith.constant 0 : index
    %13 = vector.load %arg4[%c0_12, %c0_13, %c0_14] : memref<3x64x128xf32, #tpu.memory_space<vmem>>, vector<1x64x128xf32>
    %14 = vector.shape_cast %13 : vector<1x64x128xf32> to vector<64x128xf32>
    %cst_15 = arith.constant dense<0.000000e+00> : vector<2x128xf32>
    %15 = tpu.matmul %12, %14, %cst_15 {dimension_numbers = #tpu.dot_dimension_numbers<[1], [0], [0], [1], [0, 0, 1, 1], [], []>} : vector<2x64xf32>, vector<64x128xf32>, vector<2x128xf32> -> vector<2x128xf32>
    %c1_16 = arith.constant 1 : index
    %c0_17 = arith.constant 0 : index
    %16 = vector.load %arg13[%c1_16, %c0_17] : memref<4x64xf32, #tpu.memory_space<vmem>>, vector<2x64xf32>
    %c1_18 = arith.constant 1 : index
    %c0_19 = arith.constant 0 : index
    %c0_20 = arith.constant 0 : index
    %17 = vector.load %arg4[%c1_18, %c0_19, %c0_20] : memref<3x64x128xf32, #tpu.memory_space<vmem>>, vector<1x64x128xf32>
    %18 = vector.shape_cast %17 : vector<1x64x128xf32> to vector<64x128xf32>
    %cst_21 = arith.constant dense<0.000000e+00> : vector<2x128xf32>
    %19 = tpu.matmul %16, %18, %cst_21 {dimension_numbers = #tpu.dot_dimension_numbers<[1], [0], [0], [1], [0, 0, 1, 1], [], []>} : vector<2x64xf32>, vector<64x128xf32>, vector<2x128xf32> -> vector<2x128xf32>
    %20 = arith.addf %15, %19 : vector<2x128xf32>
    %c2_22 = arith.constant 2 : index
    %c0_23 = arith.constant 0 : index
    %21 = vector.load %arg13[%c2_22, %c0_23] : memref<4x64xf32, #tpu.memory_space<vmem>>, vector<2x64xf32>
    %c2_24 = arith.constant 2 : index
    %c0_25 = arith.constant 0 : index
    %c0_26 = arith.constant 0 : index
    %22 = vector.load %arg4[%c2_24, %c0_25, %c0_26] : memref<3x64x128xf32, #tpu.memory_space<vmem>>, vector<1x64x128xf32>
    %23 = vector.shape_cast %22 : vector<1x64x128xf32> to vector<64x128xf32>
    %cst_27 = arith.constant dense<0.000000e+00> : vector<2x128xf32>
    %24 = tpu.matmul %21, %23, %cst_27 {dimension_numbers = #tpu.dot_dimension_numbers<[1], [0], [0], [1], [0, 0, 1, 1], [], []>} : vector<2x64xf32>, vector<64x128xf32>, vector<2x128xf32> -> vector<2x128xf32>
    %25 = arith.addf %20, %24 : vector<2x128xf32>
    %c0_28 = arith.constant 0 : index
    %c0_29 = arith.constant 0 : index
    %26 = vector.load %arg5[%c0_28, %c0_29] : memref<1x128xf32, #tpu.memory_space<vmem>>, vector<1x128xf32>
    %27 = vector.broadcast %26 : vector<1x128xf32> to vector<2x128xf32>
    %28 = arith.addf %25, %27 : vector<2x128xf32>
    %cst_30 = arith.constant 0.000000e+00 : f32
    %29 = vector.broadcast %cst_30 : f32 to vector<2x128xf32>
    %30 = arith.maximumf %28, %29 : vector<2x128xf32>
    %cst_31 = arith.constant 0.000000e+00 : f32
    %31 = vector.broadcast %cst_31 : f32 to vector<6x96xf32>
    %c0_32 = arith.constant 0 : index
    %c0_33 = arith.constant 0 : index
    %32 = vector.load %arg14[%c0_32, %c0_33] : memref<6x96xf32, #tpu.memory_space<vmem>>, vector<6x96xf32>
    tpu.vector_store %arg14[%c0_32, %c0_33], %31 {strides = array<i32>} : memref<6x96xf32, #tpu.memory_space<vmem>>, vector<6x96xf32>,
    %33 = vector.extract_strided_slice %30 {offsets = [0, 0], sizes = [1, 64], strides = [1, 1]} : vector<2x128xf32> to vector<1x64xf32>
    %c1_34 = arith.constant 1 : index
    %c16_35 = arith.constant 16 : index
    %34 = vector.load %arg14[%c1_34, %c16_35] : memref<6x96xf32, #tpu.memory_space<vmem>>, vector<1x64xf32>
    tpu.vector_store %arg14[%c1_34, %c16_35], %33 {strides = array<i32>} : memref<6x96xf32, #tpu.memory_space<vmem>>, vector<1x64xf32>,
    %35 = vector.extract_strided_slice %30 {offsets = [0, 64], sizes = [1, 64], strides = [1, 1]} : vector<2x128xf32> to vector<1x64xf32>
    %c2_36 = arith.constant 2 : index
    %c16_37 = arith.constant 16 : index
    %36 = vector.load %arg14[%c2_36, %c16_37] : memref<6x96xf32, #tpu.memory_space<vmem>>, vector<1x64xf32>
    tpu.vector_store %arg14[%c2_36, %c16_37], %35 {strides = array<i32>} : memref<6x96xf32, #tpu.memory_space<vmem>>, vector<1x64xf32>,
    %37 = vector.extract_strided_slice %30 {offsets = [1, 0], sizes = [1, 64], strides = [1, 1]} : vector<2x128xf32> to vector<1x64xf32>
    %c3 = arith.constant 3 : index
    %c16_38 = arith.constant 16 : index
    %38 = vector.load %arg14[%c3, %c16_38] : memref<6x96xf32, #tpu.memory_space<vmem>>, vector<1x64xf32>
    tpu.vector_store %arg14[%c3, %c16_38], %37 {strides = array<i32>} : memref<6x96xf32, #tpu.memory_space<vmem>>, vector<1x64xf32>,
    %39 = vector.extract_strided_slice %30 {offsets = [1, 64], sizes = [1, 64], strides = [1, 1]} : vector<2x128xf32> to vector<1x64xf32>
    %c4 = arith.constant 4 : index
    %c16_39 = arith.constant 16 : index
    %40 = vector.load %arg14[%c4, %c16_39] : memref<6x96xf32, #tpu.memory_space<vmem>>, vector<1x64xf32>
    tpu.vector_store %arg14[%c4, %c16_39], %39 {strides = array<i32>} : memref<6x96xf32, #tpu.memory_space<vmem>>, vector<1x64xf32>,
    %c0_40 = arith.constant 0 : index
    %c0_41 = arith.constant 0 : index
    %41 = vector.load %arg14[%c0_40, %c0_41] : memref<6x96xf32, #tpu.memory_space<vmem>>, vector<4x96xf32>
    %c0_42 = arith.constant 0 : index
    %c0_43 = arith.constant 0 : index
    %c0_44 = arith.constant 0 : index
    %42 = vector.load %arg6[%c0_42, %c0_43, %c0_44] : memref<3x96x256xf32, #tpu.memory_space<vmem>>, vector<1x96x256xf32>
    %43 = vector.shape_cast %42 : vector<1x96x256xf32> to vector<96x256xf32>
    %cst_45 = arith.constant dense<0.000000e+00> : vector<4x256xf32>
    %44 = tpu.matmul %41, %43, %cst_45 {dimension_numbers = #tpu.dot_dimension_numbers<[1], [0], [0], [1], [0, 0, 1, 1], [], []>} : vector<4x96xf32>, vector<96x256xf32>, vector<4x256xf32> -> vector<4x256xf32>
    %c1_46 = arith.constant 1 : index
    %c0_47 = arith.constant 0 : index
    %45 = vector.load %arg14[%c1_46, %c0_47] : memref<6x96xf32, #tpu.memory_space<vmem>>, vector<4x96xf32>
    %c1_48 = arith.constant 1 : index
    %c0_49 = arith.constant 0 : index
    %c0_50 = arith.constant 0 : index
    %46 = vector.load %arg6[%c1_48, %c0_49, %c0_50] : memref<3x96x256xf32, #tpu.memory_space<vmem>>, vector<1x96x256xf32>
    %47 = vector.shape_cast %46 : vector<1x96x256xf32> to vector<96x256xf32>
    %cst_51 = arith.constant dense<0.000000e+00> : vector<4x256xf32>
    %48 = tpu.matmul %45, %47, %cst_51 {dimension_numbers = #tpu.dot_dimension_numbers<[1], [0], [0], [1], [0, 0, 1, 1], [], []>} : vector<4x96xf32>, vector<96x256xf32>, vector<4x256xf32> -> vector<4x256xf32>
    %49 = arith.addf %44, %48 : vector<4x256xf32>
    %c2_52 = arith.constant 2 : index
    %c0_53 = arith.constant 0 : index
    %50 = vector.load %arg14[%c2_52, %c0_53] : memref<6x96xf32, #tpu.memory_space<vmem>>, vector<4x96xf32>
    %c2_54 = arith.constant 2 : index
    %c0_55 = arith.constant 0 : index
    %c0_56 = arith.constant 0 : index
    %51 = vector.load %arg6[%c2_54, %c0_55, %c0_56] : memref<3x96x256xf32, #tpu.memory_space<vmem>>, vector<1x96x256xf32>
    %52 = vector.shape_cast %51 : vector<1x96x256xf32> to vector<96x256xf32>
    %cst_57 = arith.constant dense<0.000000e+00> : vector<4x256xf32>
    %53 = tpu.matmul %50, %52, %cst_57 {dimension_numbers = #tpu.dot_dimension_numbers<[1], [0], [0], [1], [0, 0, 1, 1], [], []>} : vector<4x96xf32>, vector<96x256xf32>, vector<4x256xf32> -> vector<4x256xf32>
    %54 = arith.addf %49, %53 : vector<4x256xf32>
    %c0_58 = arith.constant 0 : index
    %c0_59 = arith.constant 0 : index
    %55 = vector.load %arg7[%c0_58, %c0_59] : memref<1x256xf32, #tpu.memory_space<vmem>>, vector<1x256xf32>
    %56 = vector.broadcast %55 : vector<1x256xf32> to vector<4x256xf32>
    %57 = arith.addf %54, %56 : vector<4x256xf32>
    %cst_60 = arith.constant 0.000000e+00 : f32
    %58 = vector.broadcast %cst_60 : f32 to vector<4x256xf32>
    %59 = arith.maximumf %57, %58 : vector<4x256xf32>
    %cst_61 = arith.constant 0.000000e+00 : f32
    %60 = vector.broadcast %cst_61 : f32 to vector<10x160xf32>
    %c0_62 = arith.constant 0 : index
    %c0_63 = arith.constant 0 : index
    %61 = vector.load %arg15[%c0_62, %c0_63] : memref<10x160xf32, #tpu.memory_space<vmem>>, vector<10x160xf32>
    tpu.vector_store %arg15[%c0_62, %c0_63], %60 {strides = array<i32>} : memref<10x160xf32, #tpu.memory_space<vmem>>, vector<10x160xf32>,
    %62 = vector.extract_strided_slice %59 {offsets = [0, 0], sizes = [1, 128], strides = [1, 1]} : vector<4x256xf32> to vector<1x128xf32>
    %c1_64 = arith.constant 1 : index
    %c16_65 = arith.constant 16 : index
    %63 = vector.load %arg15[%c1_64, %c16_65] : memref<10x160xf32, #tpu.memory_space<vmem>>, vector<1x128xf32>
    tpu.vector_store %arg15[%c1_64, %c16_65], %62 {strides = array<i32>} : memref<10x160xf32, #tpu.memory_space<vmem>>, vector<1x128xf32>,
    %64 = vector.extract_strided_slice %59 {offsets = [0, 128], sizes = [1, 128], strides = [1, 1]} : vector<4x256xf32> to vector<1x128xf32>
    %c2_66 = arith.constant 2 : index
    %c16_67 = arith.constant 16 : index
    %65 = vector.load %arg15[%c2_66, %c16_67] : memref<10x160xf32, #tpu.memory_space<vmem>>, vector<1x128xf32>
    tpu.vector_store %arg15[%c2_66, %c16_67], %64 {strides = array<i32>} : memref<10x160xf32, #tpu.memory_space<vmem>>, vector<1x128xf32>,
    %66 = vector.extract_strided_slice %59 {offsets = [1, 0], sizes = [1, 128], strides = [1, 1]} : vector<4x256xf32> to vector<1x128xf32>
    %c3_68 = arith.constant 3 : index
    %c16_69 = arith.constant 16 : index
    %67 = vector.load %arg15[%c3_68, %c16_69] : memref<10x160xf32, #tpu.memory_space<vmem>>, vector<1x128xf32>
    tpu.vector_store %arg15[%c3_68, %c16_69], %66 {strides = array<i32>} : memref<10x160xf32, #tpu.memory_space<vmem>>, vector<1x128xf32>,
    %68 = vector.extract_strided_slice %59 {offsets = [1, 128], sizes = [1, 128], strides = [1, 1]} : vector<4x256xf32> to vector<1x128xf32>
    %c4_70 = arith.constant 4 : index
    %c16_71 = arith.constant 16 : index
    %69 = vector.load %arg15[%c4_70, %c16_71] : memref<10x160xf32, #tpu.memory_space<vmem>>, vector<1x128xf32>
    tpu.vector_store %arg15[%c4_70, %c16_71], %68 {strides = array<i32>} : memref<10x160xf32, #tpu.memory_space<vmem>>, vector<1x128xf32>,
    %70 = vector.extract_strided_slice %59 {offsets = [2, 0], sizes = [1, 128], strides = [1, 1]} : vector<4x256xf32> to vector<1x128xf32>
    %c5 = arith.constant 5 : index
    %c16_72 = arith.constant 16 : index
    %71 = vector.load %arg15[%c5, %c16_72] : memref<10x160xf32, #tpu.memory_space<vmem>>, vector<1x128xf32>
    tpu.vector_store %arg15[%c5, %c16_72], %70 {strides = array<i32>} : memref<10x160xf32, #tpu.memory_space<vmem>>, vector<1x128xf32>,
    %72 = vector.extract_strided_slice %59 {offsets = [2, 128], sizes = [1, 128], strides = [1, 1]} : vector<4x256xf32> to vector<1x128xf32>
    %c6 = arith.constant 6 : index
    %c16_73 = arith.constant 16 : index
    %73 = vector.load %arg15[%c6, %c16_73] : memref<10x160xf32, #tpu.memory_space<vmem>>, vector<1x128xf32>
    tpu.vector_store %arg15[%c6, %c16_73], %72 {strides = array<i32>} : memref<10x160xf32, #tpu.memory_space<vmem>>, vector<1x128xf32>,
    %74 = vector.extract_strided_slice %59 {offsets = [3, 0], sizes = [1, 128], strides = [1, 1]} : vector<4x256xf32> to vector<1x128xf32>
    %c7 = arith.constant 7 : index
    %c16_74 = arith.constant 16 : index
    %75 = vector.load %arg15[%c7, %c16_74] : memref<10x160xf32, #tpu.memory_space<vmem>>, vector<1x128xf32>
    tpu.vector_store %arg15[%c7, %c16_74], %74 {strides = array<i32>} : memref<10x160xf32, #tpu.memory_space<vmem>>, vector<1x128xf32>,
    %76 = vector.extract_strided_slice %59 {offsets = [3, 128], sizes = [1, 128], strides = [1, 1]} : vector<4x256xf32> to vector<1x128xf32>
    %c8 = arith.constant 8 : index
    %c16_75 = arith.constant 16 : index
    %77 = vector.load %arg15[%c8, %c16_75] : memref<10x160xf32, #tpu.memory_space<vmem>>, vector<1x128xf32>
    tpu.vector_store %arg15[%c8, %c16_75], %76 {strides = array<i32>} : memref<10x160xf32, #tpu.memory_space<vmem>>, vector<1x128xf32>,
    %c0_76 = arith.constant 0 : index
    %c0_77 = arith.constant 0 : index
    %78 = vector.load %arg15[%c0_76, %c0_77] : memref<10x160xf32, #tpu.memory_space<vmem>>, vector<8x160xf32>
    %c0_78 = arith.constant 0 : index
    %c0_79 = arith.constant 0 : index
    %c0_80 = arith.constant 0 : index
    %79 = vector.load %arg8[%c0_78, %c0_79, %c0_80] : memref<3x160x512xf32, #tpu.memory_space<vmem>>, vector<1x160x512xf32>
    %80 = vector.shape_cast %79 : vector<1x160x512xf32> to vector<160x512xf32>
    %cst_81 = arith.constant dense<0.000000e+00> : vector<8x512xf32>
    %81 = tpu.matmul %78, %80, %cst_81 {dimension_numbers = #tpu.dot_dimension_numbers<[1], [0], [0], [1], [0, 0, 1, 1], [], []>} : vector<8x160xf32>, vector<160x512xf32>, vector<8x512xf32> -> vector<8x512xf32>
    %c1_82 = arith.constant 1 : index
    %c0_83 = arith.constant 0 : index
    %82 = vector.load %arg15[%c1_82, %c0_83] : memref<10x160xf32, #tpu.memory_space<vmem>>, vector<8x160xf32>
    %c1_84 = arith.constant 1 : index
    %c0_85 = arith.constant 0 : index
    %c0_86 = arith.constant 0 : index
    %83 = vector.load %arg8[%c1_84, %c0_85, %c0_86] : memref<3x160x512xf32, #tpu.memory_space<vmem>>, vector<1x160x512xf32>
    %84 = vector.shape_cast %83 : vector<1x160x512xf32> to vector<160x512xf32>
    %cst_87 = arith.constant dense<0.000000e+00> : vector<8x512xf32>
    %85 = tpu.matmul %82, %84, %cst_87 {dimension_numbers = #tpu.dot_dimension_numbers<[1], [0], [0], [1], [0, 0, 1, 1], [], []>} : vector<8x160xf32>, vector<160x512xf32>, vector<8x512xf32> -> vector<8x512xf32>
    %86 = arith.addf %81, %85 : vector<8x512xf32>
    %c2_88 = arith.constant 2 : index
    %c0_89 = arith.constant 0 : index
    %87 = vector.load %arg15[%c2_88, %c0_89] : memref<10x160xf32, #tpu.memory_space<vmem>>, vector<8x160xf32>
    %c2_90 = arith.constant 2 : index
    %c0_91 = arith.constant 0 : index
    %c0_92 = arith.constant 0 : index
    %88 = vector.load %arg8[%c2_90, %c0_91, %c0_92] : memref<3x160x512xf32, #tpu.memory_space<vmem>>, vector<1x160x512xf32>
    %89 = vector.shape_cast %88 : vector<1x160x512xf32> to vector<160x512xf32>
    %cst_93 = arith.constant dense<0.000000e+00> : vector<8x512xf32>
    %90 = tpu.matmul %87, %89, %cst_93 {dimension_numbers = #tpu.dot_dimension_numbers<[1], [0], [0], [1], [0, 0, 1, 1], [], []>} : vector<8x160xf32>, vector<160x512xf32>, vector<8x512xf32> -> vector<8x512xf32>
    %91 = arith.addf %86, %90 : vector<8x512xf32>
    %c0_94 = arith.constant 0 : index
    %c0_95 = arith.constant 0 : index
    %92 = vector.load %arg9[%c0_94, %c0_95] : memref<1x512xf32, #tpu.memory_space<vmem>>, vector<1x512xf32>
    %93 = vector.broadcast %92 : vector<1x512xf32> to vector<8x512xf32>
    %94 = arith.addf %91, %93 : vector<8x512xf32>
    %cst_96 = arith.constant 0.000000e+00 : f32
    %95 = vector.broadcast %cst_96 : f32 to vector<8x512xf32>
    %96 = arith.maximumf %94, %95 : vector<8x512xf32>
    %cst_97 = arith.constant 0.000000e+00 : f32
    %97 = vector.broadcast %cst_97 : f32 to vector<18x288xf32>
    %c0_98 = arith.constant 0 : index
    %c0_99 = arith.constant 0 : index
    %98 = vector.load %arg16[%c0_98, %c0_99] : memref<18x288xf32, #tpu.memory_space<vmem>>, vector<18x288xf32>
    tpu.vector_store %arg16[%c0_98, %c0_99], %97 {strides = array<i32>} : memref<18x288xf32, #tpu.memory_space<vmem>>, vector<18x288xf32>,
    %99 = vector.extract_strided_slice %96 {offsets = [0, 0], sizes = [1, 256], strides = [1, 1]} : vector<8x512xf32> to vector<1x256xf32>
    %c1_100 = arith.constant 1 : index
    %c16_101 = arith.constant 16 : index
    %100 = vector.load %arg16[%c1_100, %c16_101] : memref<18x288xf32, #tpu.memory_space<vmem>>, vector<1x256xf32>
    tpu.vector_store %arg16[%c1_100, %c16_101], %99 {strides = array<i32>} : memref<18x288xf32, #tpu.memory_space<vmem>>, vector<1x256xf32>,
    %101 = vector.extract_strided_slice %96 {offsets = [0, 256], sizes = [1, 256], strides = [1, 1]} : vector<8x512xf32> to vector<1x256xf32>
    %c2_102 = arith.constant 2 : index
    %c16_103 = arith.constant 16 : index
    %102 = vector.load %arg16[%c2_102, %c16_103] : memref<18x288xf32, #tpu.memory_space<vmem>>, vector<1x256xf32>
    tpu.vector_store %arg16[%c2_102, %c16_103], %101 {strides = array<i32>} : memref<18x288xf32, #tpu.memory_space<vmem>>, vector<1x256xf32>,
    %103 = vector.extract_strided_slice %96 {offsets = [1, 0], sizes = [1, 256], strides = [1, 1]} : vector<8x512xf32> to vector<1x256xf32>
    %c3_104 = arith.constant 3 : index
    %c16_105 = arith.constant 16 : index
    %104 = vector.load %arg16[%c3_104, %c16_105] : memref<18x288xf32, #tpu.memory_space<vmem>>, vector<1x256xf32>
    tpu.vector_store %arg16[%c3_104, %c16_105], %103 {strides = array<i32>} : memref<18x288xf32, #tpu.memory_space<vmem>>, vector<1x256xf32>,
    %105 = vector.extract_strided_slice %96 {offsets = [1, 256], sizes = [1, 256], strides = [1, 1]} : vector<8x512xf32> to vector<1x256xf32>
    %c4_106 = arith.constant 4 : index
    %c16_107 = arith.constant 16 : index
    %106 = vector.load %arg16[%c4_106, %c16_107] : memref<18x288xf32, #tpu.memory_space<vmem>>, vector<1x256xf32>
    tpu.vector_store %arg16[%c4_106, %c16_107], %105 {strides = array<i32>} : memref<18x288xf32, #tpu.memory_space<vmem>>, vector<1x256xf32>,
    %107 = vector.extract_strided_slice %96 {offsets = [2, 0], sizes = [1, 256], strides = [1, 1]} : vector<8x512xf32> to vector<1x256xf32>
    %c5_108 = arith.constant 5 : index
    %c16_109 = arith.constant 16 : index
    %108 = vector.load %arg16[%c5_108, %c16_109] : memref<18x288xf32, #tpu.memory_space<vmem>>, vector<1x256xf32>
    tpu.vector_store %arg16[%c5_108, %c16_109], %107 {strides = array<i32>} : memref<18x288xf32, #tpu.memory_space<vmem>>, vector<1x256xf32>,
    %109 = vector.extract_strided_slice %96 {offsets = [2, 256], sizes = [1, 256], strides = [1, 1]} : vector<8x512xf32> to vector<1x256xf32>
    %c6_110 = arith.constant 6 : index
    %c16_111 = arith.constant 16 : index
    %110 = vector.load %arg16[%c6_110, %c16_111] : memref<18x288xf32, #tpu.memory_space<vmem>>, vector<1x256xf32>
    tpu.vector_store %arg16[%c6_110, %c16_111], %109 {strides = array<i32>} : memref<18x288xf32, #tpu.memory_space<vmem>>, vector<1x256xf32>,
    %111 = vector.extract_strided_slice %96 {offsets = [3, 0], sizes = [1, 256], strides = [1, 1]} : vector<8x512xf32> to vector<1x256xf32>
    %c7_112 = arith.constant 7 : index
    %c16_113 = arith.constant 16 : index
    %112 = vector.load %arg16[%c7_112, %c16_113] : memref<18x288xf32, #tpu.memory_space<vmem>>, vector<1x256xf32>
    tpu.vector_store %arg16[%c7_112, %c16_113], %111 {strides = array<i32>} : memref<18x288xf32, #tpu.memory_space<vmem>>, vector<1x256xf32>,
    %113 = vector.extract_strided_slice %96 {offsets = [3, 256], sizes = [1, 256], strides = [1, 1]} : vector<8x512xf32> to vector<1x256xf32>
    %c8_114 = arith.constant 8 : index
    %c16_115 = arith.constant 16 : index
    %114 = vector.load %arg16[%c8_114, %c16_115] : memref<18x288xf32, #tpu.memory_space<vmem>>, vector<1x256xf32>
    tpu.vector_store %arg16[%c8_114, %c16_115], %113 {strides = array<i32>} : memref<18x288xf32, #tpu.memory_space<vmem>>, vector<1x256xf32>,
    %115 = vector.extract_strided_slice %96 {offsets = [4, 0], sizes = [1, 256], strides = [1, 1]} : vector<8x512xf32> to vector<1x256xf32>
    %c9 = arith.constant 9 : index
    %c16_116 = arith.constant 16 : index
    %116 = vector.load %arg16[%c9, %c16_116] : memref<18x288xf32, #tpu.memory_space<vmem>>, vector<1x256xf32>
    tpu.vector_store %arg16[%c9, %c16_116], %115 {strides = array<i32>} : memref<18x288xf32, #tpu.memory_space<vmem>>, vector<1x256xf32>,
    %117 = vector.extract_strided_slice %96 {offsets = [4, 256], sizes = [1, 256], strides = [1, 1]} : vector<8x512xf32> to vector<1x256xf32>
    %c10 = arith.constant 10 : index
    %c16_117 = arith.constant 16 : index
    %118 = vector.load %arg16[%c10, %c16_117] : memref<18x288xf32, #tpu.memory_space<vmem>>, vector<1x256xf32>
    tpu.vector_store %arg16[%c10, %c16_117], %117 {strides = array<i32>} : memref<18x288xf32, #tpu.memory_space<vmem>>, vector<1x256xf32>,
    %119 = vector.extract_strided_slice %96 {offsets = [5, 0], sizes = [1, 256], strides = [1, 1]} : vector<8x512xf32> to vector<1x256xf32>
    %c11 = arith.constant 11 : index
    %c16_118 = arith.constant 16 : index
    %120 = vector.load %arg16[%c11, %c16_118] : memref<18x288xf32, #tpu.memory_space<vmem>>, vector<1x256xf32>
    tpu.vector_store %arg16[%c11, %c16_118], %119 {strides = array<i32>} : memref<18x288xf32, #tpu.memory_space<vmem>>, vector<1x256xf32>,
    %121 = vector.extract_strided_slice %96 {offsets = [5, 256], sizes = [1, 256], strides = [1, 1]} : vector<8x512xf32> to vector<1x256xf32>
    %c12 = arith.constant 12 : index
    %c16_119 = arith.constant 16 : index
    %122 = vector.load %arg16[%c12, %c16_119] : memref<18x288xf32, #tpu.memory_space<vmem>>, vector<1x256xf32>
    tpu.vector_store %arg16[%c12, %c16_119], %121 {strides = array<i32>} : memref<18x288xf32, #tpu.memory_space<vmem>>, vector<1x256xf32>,
    %123 = vector.extract_strided_slice %96 {offsets = [6, 0], sizes = [1, 256], strides = [1, 1]} : vector<8x512xf32> to vector<1x256xf32>
    %c13 = arith.constant 13 : index
    %c16_120 = arith.constant 16 : index
    %124 = vector.load %arg16[%c13, %c16_120] : memref<18x288xf32, #tpu.memory_space<vmem>>, vector<1x256xf32>
    tpu.vector_store %arg16[%c13, %c16_120], %123 {strides = array<i32>} : memref<18x288xf32, #tpu.memory_space<vmem>>, vector<1x256xf32>,
    %125 = vector.extract_strided_slice %96 {offsets = [6, 256], sizes = [1, 256], strides = [1, 1]} : vector<8x512xf32> to vector<1x256xf32>
    %c14 = arith.constant 14 : index
    %c16_121 = arith.constant 16 : index
    %126 = vector.load %arg16[%c14, %c16_121] : memref<18x288xf32, #tpu.memory_space<vmem>>, vector<1x256xf32>
    tpu.vector_store %arg16[%c14, %c16_121], %125 {strides = array<i32>} : memref<18x288xf32, #tpu.memory_space<vmem>>, vector<1x256xf32>,
    %127 = vector.extract_strided_slice %96 {offsets = [7, 0], sizes = [1, 256], strides = [1, 1]} : vector<8x512xf32> to vector<1x256xf32>
    %c15 = arith.constant 15 : index
    %c16_122 = arith.constant 16 : index
    %128 = vector.load %arg16[%c15, %c16_122] : memref<18x288xf32, #tpu.memory_space<vmem>>, vector<1x256xf32>
    tpu.vector_store %arg16[%c15, %c16_122], %127 {strides = array<i32>} : memref<18x288xf32, #tpu.memory_space<vmem>>, vector<1x256xf32>,
    %129 = vector.extract_strided_slice %96 {offsets = [7, 256], sizes = [1, 256], strides = [1, 1]} : vector<8x512xf32> to vector<1x256xf32>
    %c16_123 = arith.constant 16 : index
    %c16_124 = arith.constant 16 : index
    %130 = vector.load %arg16[%c16_123, %c16_124] : memref<18x288xf32, #tpu.memory_space<vmem>>, vector<1x256xf32>
    tpu.vector_store %arg16[%c16_123, %c16_124], %129 {strides = array<i32>} : memref<18x288xf32, #tpu.memory_space<vmem>>, vector<1x256xf32>,
    %c0_125 = arith.constant 0 : index
    %c0_126 = arith.constant 0 : index
    %131 = vector.load %arg16[%c0_125, %c0_126] : memref<18x288xf32, #tpu.memory_space<vmem>>, vector<16x288xf32>
    %c0_127 = arith.constant 0 : index
    %c0_128 = arith.constant 0 : index
    %c0_129 = arith.constant 0 : index
    %132 = vector.load %arg10[%c0_127, %c0_128, %c0_129] : memref<3x288x64xf32, #tpu.memory_space<vmem>>, vector<1x288x64xf32>
    %133 = vector.shape_cast %132 : vector<1x288x64xf32> to vector<288x64xf32>
    %cst_130 = arith.constant dense<0.000000e+00> : vector<16x64xf32>
    %134 = tpu.matmul %131, %133, %cst_130 {dimension_numbers = #tpu.dot_dimension_numbers<[1], [0], [0], [1], [0, 0, 1, 1], [], []>} : vector<16x288xf32>, vector<288x64xf32>, vector<16x64xf32> -> vector<16x64xf32>
    %c1_131 = arith.constant 1 : index
    %c0_132 = arith.constant 0 : index
    %135 = vector.load %arg16[%c1_131, %c0_132] : memref<18x288xf32, #tpu.memory_space<vmem>>, vector<16x288xf32>
    %c1_133 = arith.constant 1 : index
    %c0_134 = arith.constant 0 : index
    %c0_135 = arith.constant 0 : index
    %136 = vector.load %arg10[%c1_133, %c0_134, %c0_135] : memref<3x288x64xf32, #tpu.memory_space<vmem>>, vector<1x288x64xf32>
    %137 = vector.shape_cast %136 : vector<1x288x64xf32> to vector<288x64xf32>
    %cst_136 = arith.constant dense<0.000000e+00> : vector<16x64xf32>
    %138 = tpu.matmul %135, %137, %cst_136 {dimension_numbers = #tpu.dot_dimension_numbers<[1], [0], [0], [1], [0, 0, 1, 1], [], []>} : vector<16x288xf32>, vector<288x64xf32>, vector<16x64xf32> -> vector<16x64xf32>
    %139 = arith.addf %134, %138 : vector<16x64xf32>
    %c2_137 = arith.constant 2 : index
    %c0_138 = arith.constant 0 : index
    %140 = vector.load %arg16[%c2_137, %c0_138] : memref<18x288xf32, #tpu.memory_space<vmem>>, vector<16x288xf32>
    %c2_139 = arith.constant 2 : index
    %c0_140 = arith.constant 0 : index
    %c0_141 = arith.constant 0 : index
    %141 = vector.load %arg10[%c2_139, %c0_140, %c0_141] : memref<3x288x64xf32, #tpu.memory_space<vmem>>, vector<1x288x64xf32>
    %142 = vector.shape_cast %141 : vector<1x288x64xf32> to vector<288x64xf32>
    %cst_142 = arith.constant dense<0.000000e+00> : vector<16x64xf32>
    %143 = tpu.matmul %140, %142, %cst_142 {dimension_numbers = #tpu.dot_dimension_numbers<[1], [0], [0], [1], [0, 0, 1, 1], [], []>} : vector<16x288xf32>, vector<288x64xf32>, vector<16x64xf32> -> vector<16x64xf32>
    %144 = arith.addf %139, %143 : vector<16x64xf32>
    %c0_143 = arith.constant 0 : index
    %c0_144 = arith.constant 0 : index
    %145 = vector.load %arg11[%c0_143, %c0_144] : memref<1x64xf32, #tpu.memory_space<vmem>>, vector<1x64xf32>
    %146 = vector.broadcast %145 : vector<1x64xf32> to vector<16x64xf32>
    %147 = arith.addf %144, %146 : vector<16x64xf32>
    %c0_145 = arith.constant 0 : index
    %c0_146 = arith.constant 0 : index
    %c0_147 = arith.constant 0 : index
    %148 = vector.load %arg12[%c0_145, %c0_146, %c0_147] : memref<1x16x64xf32, #tpu.memory_space<vmem>>, vector<1x16x64xf32>
    %149 = vector.shape_cast %148 : vector<1x16x64xf32> to vector<16x64xf32>
    %150 = vector.shape_cast %147 : vector<16x64xf32> to vector<1x16x64xf32>
    tpu.vector_store %arg12[%c0_145, %c0_146, %c0_147], %150 {strides = array<i32>} : memref<1x16x64xf32, #tpu.memory_space<vmem>>, vector<1x16x64xf32>,
    return
  }
  func.func @transform_0(%arg0: i32) -> (i32, i32, i32) {
    %c0_i32 = arith.constant 0 : i32
    %c0_i32_0 = arith.constant 0 : i32
    %c0_i32_1 = arith.constant 0 : i32
    return %arg0, %c0_i32, %c0_i32_0 : i32, i32, i32
  }
  func.func @transform_1(%arg0: i32) -> (i32, i32) {
    %c0_i32 = arith.constant 0 : i32
    %c0_i32_0 = arith.constant 0 : i32
    %c0_i32_1 = arith.constant 0 : i32
    return %c0_i32, %c0_i32_0 : i32, i32
  }
  func.func @transform_2(%arg0: i32) -> (i32, i32) {
    %c0_i32 = arith.constant 0 : i32
    %c0_i32_0 = arith.constant 0 : i32
    %c0_i32_1 = arith.constant 0 : i32
    return %c0_i32, %c0_i32_0 : i32, i32
  }
  func.func @transform_3(%arg0: i32) -> (i32, i32, i32) {
    %c0_i32 = arith.constant 0 : i32
    %c0_i32_0 = arith.constant 0 : i32
    %c0_i32_1 = arith.constant 0 : i32
    %c0_i32_2 = arith.constant 0 : i32
    return %c0_i32, %c0_i32_0, %c0_i32_1 : i32, i32, i32
  }
  func.func @transform_4(%arg0: i32) -> (i32, i32) {
    %c0_i32 = arith.constant 0 : i32
    %c0_i32_0 = arith.constant 0 : i32
    %c0_i32_1 = arith.constant 0 : i32
    return %c0_i32, %c0_i32_0 : i32, i32
  }
  func.func @transform_5(%arg0: i32) -> (i32, i32, i32) {
    %c0_i32 = arith.constant 0 : i32
    %c0_i32_0 = arith.constant 0 : i32
    %c0_i32_1 = arith.constant 0 : i32
    %c0_i32_2 = arith.constant 0 : i32
    return %c0_i32, %c0_i32_0, %c0_i32_1 : i32, i32, i32
  }
  func.func @transform_6(%arg0: i32) -> (i32, i32) {
    %c0_i32 = arith.constant 0 : i32
    %c0_i32_0 = arith.constant 0 : i32
    %c0_i32_1 = arith.constant 0 : i32
    return %c0_i32, %c0_i32_0 : i32, i32
  }
  func.func @transform_7(%arg0: i32) -> (i32, i32, i32) {
    %c0_i32 = arith.constant 0 : i32
    %c0_i32_0 = arith.constant 0 : i32
    %c0_i32_1 = arith.constant 0 : i32
    %c0_i32_2 = arith.constant 0 : i32
    return %c0_i32, %c0_i32_0, %c0_i32_1 : i32, i32, i32
  }
  func.func @transform_8(%arg0: i32) -> (i32, i32) {
    %c0_i32 = arith.constant 0 : i32
    %c0_i32_0 = arith.constant 0 : i32
    %c0_i32_1 = arith.constant 0 : i32
    return %c0_i32, %c0_i32_0 : i32, i32
  }
  func.func @transform_9(%arg0: i32) -> (i32, i32, i32) {
    %c0_i32 = arith.constant 0 : i32
    %c0_i32_0 = arith.constant 0 : i32
    %c0_i32_1 = arith.constant 0 : i32
    %c0_i32_2 = arith.constant 0 : i32
    return %c0_i32, %c0_i32_0, %c0_i32_1 : i32, i32, i32
  }
  func.func @transform_10(%arg0: i32) -> (i32, i32) {
    %c0_i32 = arith.constant 0 : i32
    %c0_i32_0 = arith.constant 0 : i32
    %c0_i32_1 = arith.constant 0 : i32
    return %c0_i32, %c0_i32_0 : i32, i32
  }
  func.func @transform_11(%arg0: i32) -> (i32, i32, i32) {
    %c0_i32 = arith.constant 0 : i32
    %c0_i32_0 = arith.constant 0 : i32
    %c0_i32_1 = arith.constant 0 : i32
    return %arg0, %c0_i32, %c0_i32_0 : i32, i32, i32
  }
}

</mosaic_0001>

<bundles_post_ra>
// kernel: a_call__.1
= control target key start
LH: loop header
LB: loop body
LE: loop exit
PB: predicated region body
PF: predicated region fallthrough
CT: control target
= control target key end

     0   :  { %s3227_s0 = inlined_call_operand.vmem [shape: f32[2,1,2], index: 0, kind: input, shape index: {}]   ;;  %s3228_s1 = inlined_call_operand.hbm [shape: f32[2,64], index: 1, kind: input, shape index: {}]   ;;  %s3229_s2 = inlined_call_operand.hbm [shape: f32[1,64], index: 2, kind: input, shape index: {}]   ;;  %s3230_s3 = inlined_call_operand.hbm [shape: f32[3,64,128], index: 3, kind: input, shape index: {}]   ;;  %s3231_s4 = inlined_call_operand.hbm [shape: f32[1,128], index: 4, kind: input, shape index: {}]   ;;  %s3232_s5 = inlined_call_operand.hbm [shape: f32[3,96,256], index: 5, kind: input, shape index: {}]   ;;  %s3233_s6 = inlined_call_operand.vmem [shape: f32[1,256], index: 6, kind: input, shape index: {}]   ;;  %s3234_s7 = inlined_call_operand.hbm [shape: f32[3,160,512], index: 7, kind: input, shape index: {}]   ;;  %s3235_s8 = inlined_call_operand.vmem [shape: f32[1,512], index: 8, kind: input, shape index: {}]   ;;  %s3236_s9 = inlined_call_operand.hbm [shape: f32[3,288,64], index: 9, kind: input, shape index: {}]   ;;  %s3237_s10 = inlined_call_operand.vmem [shape: f32[1,64], index: 10, kind: input, shape index: {}]   ;;  %s3238_s11 = inlined_call_operand.vmem [shape: f32[2,16,64], index: 11, kind: output, shape index: {}]  }
   0x1   :  { %3239 = sst [smem:[#allocation21_spill]] %s3228_s1 }
   0x2   :  { %16 = vsyncpa [#allocation7], 0 }
   0x3   :  { %17 = vsyncpa [#allocation9], 0 }
   0x4   :  { %18 = vsyncpa [#allocation12], 0 }
   0x5   :  { %19 = vsyncpa [#allocation15], 0  ;;  %s2909_s17 = smov 0  }
   0x6 LB: > { %s316_s20 = sshll.u32 %s3229_s2, 4  ;;  %s2918_s21 = sadd.s32 4294967295, %s2830_s17   ;;  %s2830_s17 = sphi %s2909_s17, %s25_s17   ;;  %s317_s20 = int_to_ptr.hbm [resolvable:$true] %s316_s20 }
   0x7   : > { %p2456_p0 = scmp.ge.s32.totalorder %s2830_s17, 1  ;;  %p292_p1 = scmp.lt.s32.totalorder %s2830_s17, 3 }
   0x8   : > { %p2557_p2 = scmp.eq.s32.totalorder %s2918_s21, 0  ;;  %s2832_s23 = smov [#allocation8]  }
   0x9   : > { %p2923_p3 = pnand %p2456_p0, %p292_p1  ;;  %s318_s24 = sshll.u32 %s2832_s23, 4  ;;  %s319_s24 = int_to_ptr.vmem [resolvable:$true] %s318_s24 }
   0xa   : > { %s342_s27 = sshll.u32 %s3231_s4, 4  ;;  %s370_s30 = sshll.u32 %s3234_s7, 4  ;;  %s343_s27 = int_to_ptr.hbm [resolvable:$true] %s342_s27  ;;  %s371_s30 = int_to_ptr.hbm [resolvable:$true] %s370_s30 }
   0xb   : > { %p2535_p4 = pneg %p2923_p3  ;;  %s2833_s13 = smov [#allocation11]  }
   0xc   : > { %s344_s14 = sshll.u32 %s2833_s13, 4  ;;  %s2834_s15 = smov [#allocation14]   ;;  %s345_s14 = int_to_ptr.vmem [resolvable:$true] %s344_s14 }
   0xd   : > { %p2937_p5 = pnand %p2557_p2, %p2535_p4  ;;  %s372_s16 = sshll.u32 %s2834_s15, 4  ;;  %s373_s16 = int_to_ptr.vmem [resolvable:$true] %s372_s16 }
   0xe   : > { %s2835_s18 = smov 512   ;;  %s2836_s19 = smov 32  }
   0xf   : > { %2541 = dma.hbm_to_vmem [thread:$0]  (!%p2937_p5), %s317_s20, 16, %s319_s24, [#allocation9]  }
  0x10   : > { %2547 = dma.hbm_to_vmem [thread:$0]  (!%p2937_p5), %s343_s27, 16, %s345_s14, [#allocation12]  }
  0x11   : > { %2553 = dma.hbm_to_vmem [thread:$0]  (!%p2937_p5), %s371_s30, 30720, %s373_s16, [#allocation15], %s2835_s18, %s2835_s18, %s2836_s19  }
  0x12   : > { %s3242_s1 = sld [smem:[#allocation21_spill]]  ;;  %s2837_s28 = smov [#allocation6]  }
  0x13   : > { %s306_s29 = sshll.u32 %s2837_s28, 4  ;;  %s327_s24 = sshll.u32 %s3230_s3, 4  ;;  %s307_s29 = int_to_ptr.vmem [resolvable:$true] %s306_s29  ;;  %s328_s24 = int_to_ptr.hbm [resolvable:$true] %s327_s24 }
  0x14   : > { %s2838_s27 = smov [#allocation10]   ;;  %s2839_s30 = smov 128  }
  0x15   : > { %s329_s14 = sshll.u32 %s2838_s27, 4  ;;  %s2840_s15 = smov 8   ;;  %s330_s14 = int_to_ptr.vmem [resolvable:$true] %s329_s14 }
  0x16   : > { %2544 = dma.hbm_to_vmem [thread:$0]  (!%p2937_p5), %s328_s24, 3072, %s330_s14, [#allocation9], %s2839_s30, %s2839_s30, %s2840_s15  }
  0x17   : > { %s353_s19 = sshll.u32 %s3232_s5, 4  ;;  %s2841_s23 = smov [#allocation13]   ;;  %s354_s19 = int_to_ptr.hbm [resolvable:$true] %s353_s19 }
  0x18   : > { %s304_s26 = sshll.u32 %s3242_s1, 4  ;;  %s355_s25 = sshll.u32 %s2841_s23, 4  ;;  %s305_s26 = int_to_ptr.hbm [resolvable:$true] %s304_s26  ;;  %s356_s25 = int_to_ptr.vmem [resolvable:$true] %s355_s25 }
  0x19   : > { %2538 = dma.hbm_to_vmem [thread:$0]  (!%p2937_p5), %s305_s26, 32, %s307_s29, [#allocation7]  }
  0x1a   : > { %s387_s29 = sshll.u32 %s3236_s9, 4  ;;  %s2842_s13 = smov 256   ;;  %s388_s29 = int_to_ptr.hbm [resolvable:$true] %s387_s29 }
  0x1b   : > { %s2843_s20 = smov 16   ;;  %s2844_s27 = smov [#allocation16]  }
  0x1c   : > { %2550 = dma.hbm_to_vmem [thread:$0]  (!%p2937_p5), %s354_s19, 9216, %s356_s25, [#allocation12], %s2842_s13, %s2842_s13, %s2843_s20  }
  0x1d   : > { %s389_s1 = sshll.u32 %s2844_s27, 4  ;;  %414 = sbr.rel (%p2923_p3) target bundleno = 1514 (0x5ea), region = 64  ;;  %s390_s1 = int_to_ptr.vmem [resolvable:$true] %s389_s1 }
  0x1e   : > { %2556 = dma.hbm_to_vmem [thread:$0]  (!%p2937_p5), %s388_s29, 13824, %s390_s1, [#allocation15], %s2839_s30, %s2839_s30, %s2840_s15  }
  0x22   : > { %2813 = dma.done.wait (%p2557_p2), [#allocation7], 32  }
  0x23   : > { %2815 = vsyncadd (%p2557_p2), [#allocation7], 4294967264 }
  0x24   : > { %2817 = dma.done.wait (%p2557_p2), [#allocation9], 3088  }
  0x25   : > { %2819 = vsyncadd (%p2557_p2), [#allocation9], 4294964208 }
  0x26   : > { %2821 = dma.done.wait (%p2557_p2), [#allocation12], 9232  }
  0x27   : > { %2823 = vsyncadd (%p2557_p2), [#allocation12], 4294958064 }
  0x28   : > { %2825 = dma.done.wait (%p2557_p2), [#allocation15], 44544  }
  0x29   : > { %2827 = vsyncadd (%p2557_p2), [#allocation15], 4294922752  ;;  %p483_p6 = scmp.lt.s32.totalorder %s2918_s21, 1  ;;  %vm498_vm0 = vcmask 1041408   ;;  %vm494_vm1 = vcmask 15360   ;;  %v552_v2 = vld [vmem:[#allocation10 + $0x78] sm:$0xff] }
  0x2a   : > { %v492_v0 = vld [vmem:[#allocation6] sm:$0x3]  ;;  %v551_v3 = vld [vmem:[#allocation10 + $0x70] sm:$0xff]  ;;  %vm522_vm2 = vcmask 519168   ;;  %565 = vmatpush.msra.mxu1 %v552_v2  ;;  %v2845_v4 = vmov 0.0   ;;  %v550_v5 = vld [vmem:[#allocation10 + $0x68] sm:$0xff] }
  0x2b   : > { %s3246_s21 = smov (!%p483_p6, %s2918_s21), 1  ;;  %2475 = vmatpush.msk.msra.mxu0 %vm498_vm0, %v492_v0  ;;  %523 = vst.msk [vmem:[#allocation2] sm:$0xf] %vm522_vm2, %v2845_v4  ;;  %v493_v6 = vld [vmem:[#allocation8] sm:$0x1]  ;;  %s2846_s24 = smov 16  }
  0x2c   : > { %s485_s12 = scalar_lea.vmem %s3227_s0, %s3246_s21  ;;  %874 = vst [vmem:[#allocation4] sm:$0xff] %v2845_v4  ;;  %566 = vmatpush.msra.mxu1 %v551_v3  ;;  %s2847_s14 = smov 112   ;;  %v549_v9 = vld [vmem:[#allocation10 + $0x60] sm:$0xff]  ;;  %v609_v10 = vld [vmem:[#allocation10 + $0xb8] sm:$0xff]  ;;  %v608_v12 = vld [vmem:[#allocation10 + $0xb0] sm:$0xff]  ;;  %vm528_vm3 = vcmask 385152  }
  0x2d   : > { %v491_v1 = vld [vmem:[%s485_s12] sm:$0x1]  ;;  %877 = vst [vmem:[#allocation4 + $0x10] sm:$0x3] %v2845_v4  ;;  %v548_v11 = vld [vmem:[#allocation10 + $0x58] sm:$0xff]  ;;  %621 = vmatpush.msra.mxu3 %v609_v10  ;;  %v547_v13 = vld [vmem:[#allocation10 + $0x50] sm:$0xff] }
  0x2e   : > { %2476 = vmatmul.msk.f32.vlgmr.msra.gmra.mxu0 %vm494_vm1, %v491_v1  ;;  %1715 = vst [vmem:[#allocation5] sm:$0xff] %v2845_v4  ;;  %567 = vmatpush.msra.mxu1 %v550_v5  ;;  %v607_v14 = vld [vmem:[#allocation10 + $0xa8] sm:$0xff]  ;;  %v606_v16 = vld [vmem:[#allocation10 + $0xa0] sm:$0xff]  ;;  %v542_v18 = vld [vmem:[#allocation10 + $0x38] sm:$0xff]  ;;  %vm553_vm4 = vcmask 523264   ;;  %vm640_vm5 = vcmask 783360  }
  0x2f   : > { %1716 = vst [vmem:[#allocation5 + $0x8] sm:$0xff] %v2845_v4  ;;  %622 = vmatpush.msra.mxu3 %v608_v12  ;;  %v546_v15 = vld [vmem:[#allocation10 + $0x48] sm:$0xff]  ;;  %v545_v17 = vld [vmem:[#allocation10 + $0x40] sm:$0xff]  ;;  %v605_v19 = vld [vmem:[#allocation10 + $0x98] sm:$0xff]  ;;  %s2848_s30 = smov 80   ;;  %vm646_vm6 = vcmask 647296  }
  0x30   : > { %1718 = vst [vmem:[#allocation5 + $0x18] sm:$0xff] %v2845_v4  ;;  %568 = vmatpush.msra.mxu1 %v549_v9  ;;  %v541_v20 = vld [vmem:[#allocation10 + $0x30] sm:$0xff]  ;;  %v540_v22 = vld [vmem:[#allocation10 + $0x28] sm:$0xff]  ;;  %v539_v24 = vld [vmem:[#allocation10 + $0x20] sm:$0xff]  ;;  %vm652_vm7 = vcmask 648321   ;;  %vm706_vm8 = vcmask 785408  }
  0x31   : > { %1719 = vst [vmem:[#allocation5 + $0x20] sm:$0xff] %v2845_v4  ;;  %623 = vmatpush.msra.mxu3 %v607_v14  ;;  %v604_v21 = vld [vmem:[#allocation10 + $0x90] sm:$0xff]  ;;  %v603_v23 = vld [vmem:[#allocation10 + $0x88] sm:$0xff]  ;;  %v602_v25 = vld [vmem:[#allocation10 + $0x80] sm:$0xff]  ;;  %vm875_vm9 = vcmask 261120   ;;  %vm878_vm10 = vcmask 254976  }
  0x32   : > { %1721 = vst [vmem:[#allocation5 + $0x30] sm:$0x3] %v2845_v4  ;;  %569 = vmatpush.msra.mxu1 %v548_v11  ;;  %v538_v26 = vld [vmem:[#allocation10 + $0x18] sm:$0xff]  ;;  %v537_v27 = vld [vmem:[#allocation10 + $0x10] sm:$0xff]  ;;  %v536_v28 = vld [vmem:[#allocation10 + $0x8] sm:$0xff]  ;;  %vm884_vm11 = vcmask 1040512  }
  0x33   : > { %1722 = vst [vmem:[#allocation5 + $0x38] sm:$0x3] %v2845_v4  ;;  %624 = vmatpush.msra.mxu3 %v606_v16  ;;  %v535_v29 = vld [vmem:[#allocation10] sm:$0xff]  ;;  %v704_v35 = vld [vmem:[#allocation13 + $0x170] sm:$0xff]  ;;  %v703_v38 = vld [vmem:[#allocation13 + $0x168] sm:$0xff]  ;;  %vm886_vm12 = vcmask 122880  }
  0x34   : > { %570 = vmatpush.msra.mxu1 %v547_v13  ;;  %v705_v36 = vld [vmem:[#allocation13 + $0x178] sm:$0xff]  ;;  %v702_v37 = vld [vmem:[#allocation13 + $0x160] sm:$0xff]  ;;  %714 = vmatpush.msrb.mxu0 %v704_v35  ;;  %641 = vst.msk [vmem:[#allocation3] sm:$0x3f] %vm640_vm5, %v2845_v4  ;;  %v700_v39 = vld [vmem:[#allocation13 + $0x150] sm:$0xff]  ;;  %vm1101_vm13 = vcmask 1046528  }
  0x35   : > { %625 = vmatpush.msra.mxu3 %v605_v19  ;;  %v701_v40 = vld [vmem:[#allocation13 + $0x158] sm:$0xff]  ;;  %v698_v41 = vld [vmem:[#allocation13 + $0x140] sm:$0xff]  ;;  %v699_v42 = vld [vmem:[#allocation13 + $0x148] sm:$0xff]  ;;  %876 = vst.msk [vmem:[#allocation4 + $0x8] sm:$0xff] %vm875_vm9, %v2845_v4  ;;  %vm1523_vm14 = vcmask 1045504   ;;  %vm1727_vm15 = vcmask 1040384  }
  0x36   : > { %571 = vmatpush.msra.mxu1 %v546_v15  ;;  %715 = vmatpush.msrb.mxu0 %v702_v37  ;;  %v678_v43 = vld [vmem:[#allocation13 + $0xb0] sm:$0xff]  ;;  %v679_v44 = vld [vmem:[#allocation13 + $0xb8] sm:$0xff]  ;;  %v676_v47 = vld [vmem:[#allocation13 + $0xa0] sm:$0xff]  ;;  %1717 = vst.msk [vmem:[#allocation5 + $0x10] sm:$0xff] %vm875_vm9, %v2845_v4  ;;  %vm1732_vm2 = vcmask 130048   ;;  %s2506_s23 = sshll.u32 %s3246_s21, 4 }
  0x37   : > { %626 = vmatpush.msra.mxu3 %v604_v21  ;;  %v696_v45 = vld [vmem:[#allocation13 + $0x130] sm:$0xff]  ;;  %v697_v46 = vld [vmem:[#allocation13 + $0x138] sm:$0xff]  ;;  %757 = vmatpush.msra.mxu2 %v678_v43  ;;  %v694_v49 = vld [vmem:[#allocation13 + $0x120] sm:$0xff]  ;;  %1720 = vst.msk [vmem:[#allocation5 + $0x28] sm:$0xff] %vm875_vm9, %v2845_v4  ;;  %s490_s13 = scalar_lea.vmem %s3238_s11, %s2506_s23 }
  0x38   : > { %572 = vmatpush.msra.mxu1 %v545_v17  ;;  %716 = vmatpush.msrb.mxu0 %v700_v39  ;;  %v677_v50 = vld [vmem:[#allocation13 + $0xa8] sm:$0xff]  ;;  %v674_v52 = vld [vmem:[#allocation13 + $0x90] sm:$0xff]  ;;  %v675_v53 = vld [vmem:[#allocation13 + $0x98] sm:$0xff]  ;;  %879 = vst.msk [vmem:[#allocation4 + $0x18] sm:$0x3] %vm878_vm10, %v2845_v4 }
  0x39   : > { %627 = vmatpush.msra.mxu3 %v603_v23  ;;  %v695_v51 = vld [vmem:[#allocation13 + $0x128] sm:$0xff]  ;;  %758 = vmatpush.msra.mxu2 %v676_v47  ;;  %v672_v54 = vld [vmem:[#allocation13 + $0x80] sm:$0xff]  ;;  %v692_v56 = vld [vmem:[#allocation13 + $0x110] sm:$0xff]  ;;  %1723 = vst.msk [vmem:[#allocation5 + $0x40] sm:$0x3] %vm878_vm10, %v2845_v4 }
  0x3a   : > { %588 = vmatpush.msrb.mxu1 %v542_v18  ;;  %717 = vmatpush.msrb.mxu0 %v698_v41  ;;  %v673_v55 = vld [vmem:[#allocation13 + $0x88] sm:$0xff]  ;;  %v693_v57 = vld [vmem:[#allocation13 + $0x118] sm:$0xff]  ;;  %v690_v58 = vld [vmem:[#allocation13 + $0x100] sm:$0xff] }
  0x3b   : > { %628 = vmatpush.msra.mxu3 %v602_v25  ;;  %759 = vmatpush.msra.mxu2 %v674_v52  ;;  %v691_v59 = vld [vmem:[#allocation13 + $0x108] sm:$0xff]  ;;  %v688_v60 = vld [vmem:[#allocation13 + $0xf0] sm:$0xff]  ;;  %v689_v61 = vld [vmem:[#allocation13 + $0xf8] sm:$0xff] }
  0x3c   : > { %589 = vmatpush.msrb.mxu1 %v541_v20  ;;  %718 = vmatpush.msrb.mxu0 %v696_v45  ;;  %v2596_v0 = vld [vmem:[#allocation11] ss:$0 sm:$0xff]  ;;  %v686_v1 = vld [vmem:[#allocation13 + $0xe0] sm:$0xff]  ;;  %v687_v2 = vld [vmem:[#allocation13 + $0xe8] sm:$0xff] }
  0x3d   : > { %777 = vmatpush.msrb.mxu3 %v679_v44  ;;  %760 = vmatpush.msra.mxu2 %v672_v54  ;;  %v682_v10 = vld [vmem:[#allocation13 + $0xc0] sm:$0xff]  ;;  %v683_v11 = vld [vmem:[#allocation13 + $0xc8] sm:$0xff]  ;;  %v670_v12 = vld [vmem:[#allocation13 + $0x70] sm:$0xff] }
  0x3e   : > { %590 = vmatpush.msrb.mxu1 %v540_v22  ;;  %719 = vmatpush.msrb.mxu0 %v694_v49  ;;  %v671_v13 = vld [vmem:[#allocation13 + $0x78] sm:$0xff]  ;;  %v817_v14 = vld [vmem:[#allocation13 + $0x230] sm:$0xff]  ;;  %v668_v16 = vld [vmem:[#allocation13 + $0x60] sm:$0xff] }
  0x3f   : > { %778 = vmatpush.msrb.mxu3 %v677_v50  ;;  %761 = vmatpush.msra.mxu2 %v670_v12  ;;  %v818_v15 = vld [vmem:[#allocation13 + $0x238] sm:$0xff]  ;;  %v669_v17 = vld [vmem:[#allocation13 + $0x68] sm:$0xff]  ;;  %v815_v18 = vld [vmem:[#allocation13 + $0x220] sm:$0xff] }
  0x40   : > { %591 = vmatpush.msrb.mxu1 %v539_v24  ;;  %720 = vmatpush.msrb.mxu0 %v692_v56  ;;  %v816_v19 = vld [vmem:[#allocation13 + $0x228] sm:$0xff]  ;;  %v666_v20 = vld [vmem:[#allocation13 + $0x50] sm:$0xff]  ;;  %v667_v21 = vld [vmem:[#allocation13 + $0x58] sm:$0xff] }
  0x41   : > { %779 = vmatpush.msrb.mxu3 %v675_v53  ;;  %762 = vmatpush.msra.mxu2 %v668_v16  ;;  %v813_v22 = vld [vmem:[#allocation13 + $0x210] sm:$0xff]  ;;  %v814_v23 = vld [vmem:[#allocation13 + $0x218] sm:$0xff]  ;;  %v664_v24 = vld [vmem:[#allocation13 + $0x40] sm:$0xff] }
  0x42   : > { %592 = vmatpush.msrb.mxu1 %v538_v26  ;;  %721 = vmatpush.msrb.mxu0 %v690_v58  ;;  %v665_v25 = vld [vmem:[#allocation13 + $0x48] sm:$0xff]  ;;  %v811_v26 = vld [vmem:[#allocation13 + $0x200] sm:$0xff]  ;;  %v659_v37 = vld [vmem:[#allocation13 + $0x18] sm:$0xff] }
  0x43   : > { %780 = vmatpush.msrb.mxu3 %v673_v55  ;;  %763 = vmatpush.msra.mxu2 %v666_v20  ;;  %v808_v35 = vld [vmem:[#allocation13 + $0x1e8] sm:$0xff]  ;;  %v806_v39 = vld [vmem:[#allocation13 + $0x1d8] sm:$0xff]  ;;  %v801_v44 = vld [vmem:[#allocation13 + $0x1b0] sm:$0xff] }
  0x44   : > { %593 = vmatpush.msrb.mxu1 %v537_v27  ;;  %722 = vmatpush.msrb.mxu0 %v688_v60  ;;  %v812_v27 = vld [vmem:[#allocation13 + $0x208] sm:$0xff]  ;;  %v802_v45 = vld [vmem:[#allocation13 + $0x1b8] sm:$0xff]  ;;  %v795_v50 = vld [vmem:[#allocation13 + $0x180] sm:$0xff] }
  0x45   : > { %781 = vmatpush.msrb.mxu3 %v671_v13  ;;  %764 = vmatpush.msra.mxu2 %v664_v24  ;;  %v657_v41 = vld [vmem:[#allocation13 + $0x8] sm:$0xff]  ;;  %v798_v49 = vld [vmem:[#allocation13 + $0x198] sm:$0xff]  ;;  %v1095_v20 = vld [vmem:[#allocation14 + $0x4f0] sm:$0xff] }
  0x46   : > { %594 = vmatpush.msrb.mxu1 %v536_v28  ;;  %723 = vmatpush.msrb.mxu0 %v686_v1  ;;  %v662_v28 = vld [vmem:[#allocation13 + $0x30] sm:$0xff]  ;;  %v804_v43 = vld [vmem:[#allocation13 + $0x1c8] sm:$0xff]  ;;  %v1041_v4 = vld [vmem:[#allocation14 + $0x340] sm:$0xff] }
  0x47   : > { %782 = vmatpush.msrb.mxu3 %v669_v17  ;;  %765 = vmatpush.msra.mxu2 %v662_v28  ;;  %v800_v47 = vld [vmem:[#allocation13 + $0x1a8] sm:$0xff]  ;;  %v1077_v17 = vld [vmem:[#allocation14 + $0x460] sm:$0xff]  ;;  %v1091_v24 = vld [vmem:[#allocation14 + $0x4d0] sm:$0xff] }
  0x48   : > { %595 = vmatpush.msrb.mxu1 %v535_v29  ;;  %v663_v29 = vld [vmem:[#allocation13 + $0x38] sm:$0xff]  ;;  %v1087_v28 = vld [vmem:[#allocation14 + $0x4b0] sm:$0xff] }
  0x49   : > { %783 = vmatpush.msrb.mxu3 %v667_v21  ;;  %v1073_v21 = vld [vmem:[#allocation14 + $0x440] sm:$0xff] }
  0x4b   : > { %784 = vmatpush.msrb.mxu3 %v665_v25  ;;  %v1069_v25 = vld [vmem:[#allocation14 + $0x420] sm:$0xff] }
  0x4d   : > { %785 = vmatpush.msrb.mxu3 %v663_v29  ;;  %v1065_v29 = vld [vmem:[#allocation14 + $0x400] sm:$0xff] }
  0xab   : > { %v519_v7 = vpop.f32.mrf.mxu0 }
  0xac   : > { %v520_v8 = vadd.f32 %v519_v7, %v493_v6  ;;  %v684_v6 = vld [vmem:[#allocation13 + $0xd0] sm:$0xff]  ;;  %v685_v7 = vld [vmem:[#allocation13 + $0xd8] sm:$0xff] }
  0xad   : > { %724 = vmatpush.msrb.mxu0 %v684_v6 }
  0xae   : > { %525 = vrot.lane.b32.xlu0 %v520_v8, %s2846_s24 }
  0xaf   : > { %725 = vmatpush.msrb.mxu0 %v682_v10 }
  0xb1   : > { %826 = vmatpush.msra.mxu0 %v817_v14 }
  0xb3   : > { %827 = vmatpush.msra.mxu0 %v815_v18  ;;  %v1093_v18 = vld [vmem:[#allocation14 + $0x4e0] sm:$0xff] }
  0xb5   : > { %828 = vmatpush.msra.mxu0 %v813_v22  ;;  %v1089_v22 = vld [vmem:[#allocation14 + $0x4c0] sm:$0xff] }
  0xb6   : > { %530 = vrot.lane.b32.xlu0 %v520_v8, %s2847_s14 }
  0xb7   : > { %829 = vmatpush.msra.mxu0 %v811_v26  ;;  %v1085_v26 = vld [vmem:[#allocation14 + $0x4a0] sm:$0xff] }
 0x120   : > { %v526_v30 = vpop.permute.xlu0 %525 }
 0x121   : > { %529 = vst.msk [vmem:[#allocation2 + $0x1] sm:$0x1] %vm528_vm3, %v526_v30  ;;  %v809_v30 = vld [vmem:[#allocation13 + $0x1f0] sm:$0xff] }
 0x122   : > { %830 = vmatpush.msra.mxu0 %v809_v30  ;;  %v1081_v30 = vld [vmem:[#allocation14 + $0x480] sm:$0xff] }
 0x128   : > { %v531_v31 = vpop.permute.xlu0 %530  ;;  %v534_v34 = vld [vmem:[#allocation2] sm:$0x3] }
 0x129   : > { %533 = vst.msk [vmem:[#allocation2 + $0x2] sm:$0x1] %vm528_vm3, %v531_v31  ;;  %v810_v31 = vld [vmem:[#allocation13 + $0x1f8] sm:$0xff] }
 0x130   : > { %v543_v32 = vld [vmem:[#allocation2 + $0x1] sm:$0x3] }
 0x131   : > { %v600_v33 = vld [vmem:[#allocation2 + $0x2] sm:$0x3]  ;;  %2477 = vmatmul.msk.f32.vlgmr.msra.gmra.mxu1 %vm553_vm4, %v543_v32  ;;  %v660_v32 = vld [vmem:[#allocation13 + $0x20] sm:$0xff] }
 0x132   : > { %2479 = vmatmul.msk.f32.vlgmr.msra.gmra.mxu3 %vm553_vm4, %v600_v33  ;;  %734 = vmatpush.msra.mxu1 %v705_v36  ;;  %v661_v33 = vld [vmem:[#allocation13 + $0x28] sm:$0xff]  ;;  %v658_v36 = vld [vmem:[#allocation13 + $0x10] sm:$0xff] }
 0x133   : > { %766 = vmatpush.msra.mxu2 %v660_v32  ;;  %786 = vmatpush.msrb.mxu3 %v661_v33  ;;  %v1083_v32 = vld [vmem:[#allocation14 + $0x490] sm:$0xff]  ;;  %v1061_v33 = vld [vmem:[#allocation14 + $0x3e0] sm:$0xff] }
 0x134   : > { %735 = vmatpush.msra.mxu1 %v703_v38  ;;  %v805_v38 = vld [vmem:[#allocation13 + $0x1d0] sm:$0xff] }
 0x135   : > { %767 = vmatpush.msra.mxu2 %v658_v36  ;;  %787 = vmatpush.msrb.mxu3 %v659_v37  ;;  %v1080_v36 = vld [vmem:[#allocation14 + $0x478] sm:$0xff]  ;;  %v1057_v37 = vld [vmem:[#allocation14 + $0x3c0] sm:$0xff] }
 0x136   : > { %736 = vmatpush.msra.mxu1 %v701_v40  ;;  %v656_v40 = vld [vmem:[#allocation13] sm:$0xff] }
 0x137   : > { %768 = vmatpush.msra.mxu2 %v656_v40  ;;  %788 = vmatpush.msrb.mxu3 %v657_v41  ;;  %v1076_v40 = vld [vmem:[#allocation14 + $0x458] sm:$0xff]  ;;  %v1053_v41 = vld [vmem:[#allocation14 + $0x3a0] sm:$0xff] }
 0x138   : > { %737 = vmatpush.msra.mxu1 %v699_v42  ;;  %v803_v42 = vld [vmem:[#allocation13 + $0x1c0] sm:$0xff] }
 0x139   : > { %2478 = vmatmul.msk.f32.vlgmr.msrb.gmra.mxu1 %vm553_vm4, %v534_v34  ;;  %v807_v34 = vld [vmem:[#allocation13 + $0x1e0] sm:$0xff]  ;;  %1111 = vmatpush.msrb.mxu2 %v1077_v17  ;;  %v1035_v17 = vld [vmem:[#allocation14 + $0x310] sm:$0xff] }
 0x13a   : > { %738 = vmatpush.msra.mxu1 %v697_v46  ;;  %831 = vmatpush.msra.mxu0 %v807_v34  ;;  %v799_v46 = vld [vmem:[#allocation13 + $0x1a0] sm:$0xff]  ;;  %v1078_v34 = vld [vmem:[#allocation14 + $0x468] sm:$0xff] }
 0x13b   : > { %1143 = vmatpush.msra.mxu3 %v1093_v18  ;;  %1112 = vmatpush.msrb.mxu2 %v1073_v21  ;;  %v1036_v18 = vld [vmem:[#allocation14 + $0x318] sm:$0xff]  ;;  %v1031_v21 = vld [vmem:[#allocation14 + $0x2f0] sm:$0xff] }
 0x13c   : > { %739 = vmatpush.msra.mxu1 %v695_v51  ;;  %832 = vmatpush.msra.mxu0 %v805_v38  ;;  %v796_v51 = vld [vmem:[#allocation13 + $0x188] sm:$0xff] }
 0x13d   : > { %1144 = vmatpush.msra.mxu3 %v1089_v22  ;;  %1113 = vmatpush.msrb.mxu2 %v1069_v25  ;;  %v1074_v38 = vld [vmem:[#allocation14 + $0x448] sm:$0xff]  ;;  %v1032_v22 = vld [vmem:[#allocation14 + $0x2f8] sm:$0xff]  ;;  %v1027_v25 = vld [vmem:[#allocation14 + $0x2d0] sm:$0xff] }
 0x13e   : > { %740 = vmatpush.msra.mxu1 %v693_v57  ;;  %833 = vmatpush.msra.mxu0 %v803_v42  ;;  %v1070_v42 = vld [vmem:[#allocation14 + $0x428] sm:$0xff] }
 0x13f   : > { %1145 = vmatpush.msra.mxu3 %v1085_v26  ;;  %1114 = vmatpush.msrb.mxu2 %v1065_v29  ;;  %v1028_v26 = vld [vmem:[#allocation14 + $0x2d8] sm:$0xff]  ;;  %v1023_v29 = vld [vmem:[#allocation14 + $0x2b0] sm:$0xff] }
 0x140   : > { %741 = vmatpush.msra.mxu1 %v691_v59  ;;  %834 = vmatpush.msra.mxu0 %v801_v44  ;;  %v864_v59 = vld [vmem:[%s3233_s6] sm:$0x3] }
 0x141   : > { %v867_v1 = vperm.slane %v864_v59, 1  ;;  %1146 = vmatpush.msra.mxu3 %v1081_v30  ;;  %1115 = vmatpush.msrb.mxu2 %v1061_v33  ;;  %v1072_v44 = vld [vmem:[#allocation14 + $0x438] sm:$0xff]  ;;  %v1018_v33 = vld [vmem:[#allocation14 + $0x288] sm:$0xff] }
 0x142   : > { %742 = vmatpush.msra.mxu1 %v689_v61  ;;  %835 = vmatpush.msra.mxu0 %v799_v46  ;;  %v1066_v46 = vld [vmem:[#allocation14 + $0x408] sm:$0xff]  ;;  %v1024_v30 = vld [vmem:[#allocation14 + $0x2b8] sm:$0xff] }
 0x143   : > { %1116 = vmatpush.msrb.mxu2 %v1057_v37 }
 0x144   : > { %743 = vmatpush.msra.mxu1 %v687_v2 }
 0x145   : > { %1117 = vmatpush.msrb.mxu2 %v1053_v41 }
 0x146   : > { %744 = vmatpush.msra.mxu1 %v685_v7 }
 0x148   : > { %745 = vmatpush.msra.mxu1 %v683_v11 }
 0x14a   : > { %846 = vmatpush.msrb.mxu1 %v818_v15 }
 0x14c   : > { %847 = vmatpush.msrb.mxu1 %v816_v19  ;;  %v1094_v19 = vld [vmem:[#allocation14 + $0x4e8] sm:$0xff] }
 0x14e   : > { %848 = vmatpush.msrb.mxu1 %v814_v23  ;;  %v1090_v23 = vld [vmem:[#allocation14 + $0x4c8] sm:$0xff] }
 0x150   : > { %849 = vmatpush.msrb.mxu1 %v812_v27  ;;  %v1086_v27 = vld [vmem:[#allocation14 + $0x4a8] sm:$0xff] }
 0x152   : > { %850 = vmatpush.msrb.mxu1 %v810_v31  ;;  %v1082_v31 = vld [vmem:[#allocation14 + $0x488] sm:$0xff] }
 0x154   : > { %851 = vmatpush.msrb.mxu1 %v808_v35  ;;  %v1079_v35 = vld [vmem:[#allocation14 + $0x470] sm:$0xff] }
 0x156   : > { %852 = vmatpush.msrb.mxu1 %v806_v39  ;;  %v1075_v39 = vld [vmem:[#allocation14 + $0x450] sm:$0xff] }
 0x158   : > { %853 = vmatpush.msrb.mxu1 %v804_v43  ;;  %v1071_v43 = vld [vmem:[#allocation14 + $0x430] sm:$0xff] }
 0x15a   : > { %854 = vmatpush.msrb.mxu1 %v802_v45  ;;  %v1049_v45 = vld [vmem:[#allocation14 + $0x380] sm:$0xff] }
 0x15b   : > { %1118 = vmatpush.msrb.mxu2 %v1049_v45 }
 0x15c   : > { %855 = vmatpush.msrb.mxu1 %v800_v47  ;;  %v1067_v47 = vld [vmem:[#allocation14 + $0x410] sm:$0xff] }
 0x15e   : > { %856 = vmatpush.msrb.mxu1 %v798_v49  ;;  %v1045_v49 = vld [vmem:[#allocation14 + $0x360] sm:$0xff] }
 0x15f   : > { %1119 = vmatpush.msrb.mxu2 %v1045_v49 }
 0x160   : > { %857 = vmatpush.msrb.mxu1 %v796_v51  ;;  %v1063_v51 = vld [vmem:[#allocation14 + $0x3f0] sm:$0xff] }
 0x161   : > { %1120 = vmatpush.msrb.mxu2 %v1041_v4  ;;  %v1009_v4 = vld [vmem:[#allocation14 + $0x268] sm:$0xff] }
 0x1ae   : > { %v574_v48 = vpop.f32.mrf.mxu1 }
 0x1b5   : > { %v630_v3 = vpop.f32.mrf.mxu3 }
 0x1b6   : > { %v597_v62 = vpop.f32.mrf.mxu1 }
 0x1b7   : > { %v598_v63 = vadd.f32 %v597_v62, %v574_v48  ;;  %v797_v48 = vld [vmem:[#allocation13 + $0x190] sm:$0xff] }
 0x1b8   : > { %836 = vmatpush.msra.mxu0 %v797_v48  ;;  %v1068_v48 = vld [vmem:[#allocation14 + $0x418] sm:$0xff] }
 0x1b9   : > { %v633_v5 = vadd.f32 %v630_v3, %v598_v63 }
 0x1ba   : > { %837 = vmatpush.msra.mxu0 %v795_v50  ;;  %v1062_v50 = vld [vmem:[#allocation14 + $0x3e8] sm:$0xff] }
 0x1bb   : > { %v638_v8 = vadd.f32 %v2596_v0, %v633_v5  ;;  %v866_v0 = vperm.slane %v864_v59, 0  ;;  %v1056_v59 = vld [vmem:[#allocation14 + $0x3b8] sm:$0xff] }
 0x1bd   : > { %v639_v9 = vmax.f32 %v638_v8, 0.0 }
 0x1bf   : > { %643 = vrot.lane.b32.xlu1 %v639_v9, %s2846_s24 }
 0x1c7   : > { %648 = vrot.lane.b32.xlu1 %v639_v9, %s2848_s30 }
 0x231   : > { %v644_v52 = vpop.permute.xlu1 %643 }
 0x232   : > { %647 = vst.msk [vmem:[#allocation3 + $0x1] sm:$0x1] %vm646_vm6, %v644_v52 }
 0x233   : > { %653 = vst.msk [vmem:[#allocation3 + $0x2] sm:$0x2] %vm652_vm7, %v644_v52  ;;  %v1064_v52 = vld [vmem:[#allocation14 + $0x3f8] sm:$0xff] }
 0x239   : > { %v649_v53 = vpop.permute.xlu1 %648 }
 0x23a   : > { %651 = vst.msk [vmem:[#allocation3 + $0x2] sm:$0x1] %vm646_vm6, %v649_v53 }
 0x23b   : > { %654 = vst.msk [vmem:[#allocation3 + $0x3] sm:$0x2] %vm652_vm7, %v649_v53  ;;  %v1058_v53 = vld [vmem:[#allocation14 + $0x3c8] sm:$0xff] }
 0x241   : > { %v655_v54 = vld [vmem:[#allocation3] sm:$0xf] }
 0x242   : > { %v680_v55 = vld [vmem:[#allocation3 + $0x1] sm:$0xf]  ;;  %2482 = vmatmul.msk.f32.vlgmr.msra.gmra.mxu2 %vm706_vm8, %v655_v54  ;;  %2483 = vmatmul.msk.f32.vlgmr.msrb.gmra.mxu3 %vm706_vm8, %v655_v54  ;;  %v1059_v54 = vld [vmem:[#allocation14 + $0x3d0] sm:$0xff] }
 0x243   : > { %2480 = vmatmul.msk.f32.vlgmr.msrb.gmra.mxu0 %vm706_vm8, %v680_v55  ;;  %2481 = vmatmul.msk.f32.vlgmr.msra.gmra.mxu1 %vm706_vm8, %v680_v55  ;;  %v793_v56 = vld [vmem:[#allocation3 + $0x2] sm:$0xf]  ;;  %v1060_v55 = vld [vmem:[#allocation14 + $0x3d8] sm:$0xff] }
 0x244   : > { %1183 = vmatpush.msrb.mxu0 %v1094_v19  ;;  %1223 = vmatpush.msra.mxu1 %v1095_v20  ;;  %v1096_v19 = vld [vmem:[#allocation14 + $0x4f8] sm:$0xff]  ;;  %v1030_v20 = vld [vmem:[#allocation14 + $0x2e8] sm:$0xff] }
 0x245   : > { %1151 = vmatpush.msrb.mxu3 %v1078_v34  ;;  %v1019_v34 = vld [vmem:[#allocation14 + $0x290] sm:$0xff] }
 0x246   : > { %1184 = vmatpush.msrb.mxu0 %v1090_v23  ;;  %1224 = vmatpush.msra.mxu1 %v1091_v24  ;;  %v1092_v23 = vld [vmem:[#allocation14 + $0x4d8] sm:$0xff]  ;;  %v1026_v24 = vld [vmem:[#allocation14 + $0x2c8] sm:$0xff] }
 0x247   : > { %1152 = vmatpush.msrb.mxu3 %v1074_v38 }
 0x248   : > { %1185 = vmatpush.msrb.mxu0 %v1086_v27  ;;  %1225 = vmatpush.msra.mxu1 %v1087_v28  ;;  %v1088_v27 = vld [vmem:[#allocation14 + $0x4b8] sm:$0xff]  ;;  %v1022_v28 = vld [vmem:[#allocation14 + $0x2a8] sm:$0xff] }
 0x249   : > { %1153 = vmatpush.msrb.mxu3 %v1070_v42 }
 0x24a   : > { %1186 = vmatpush.msrb.mxu0 %v1082_v31  ;;  %1226 = vmatpush.msra.mxu1 %v1083_v32  ;;  %v1084_v31 = vld [vmem:[#allocation14 + $0x498] sm:$0xff] }
 0x24b   : > { %2484 = vmatmul.msk.f32.vlgmr.msra.gmra.mxu0 %vm706_vm8, %v793_v56  ;;  %2485 = vmatmul.msk.f32.vlgmr.msrb.gmra.mxu1 %vm706_vm8, %v793_v56  ;;  %v1037_v56 = vld [vmem:[#allocation14 + $0x320] sm:$0xff] }
 0x24c   : > { %1191 = vmatpush.msra.mxu0 %v1079_v35  ;;  %1231 = vmatpush.msrb.mxu1 %v1080_v36  ;;  %v1020_v35 = vld [vmem:[#allocation14 + $0x298] sm:$0xff] }
 0x24d   : > { %1154 = vmatpush.msrb.mxu3 %v1066_v46  ;;  %1121 = vmatpush.msrb.mxu2 %v1037_v56  ;;  %v1005_v56 = vld [vmem:[#allocation14 + $0x248] sm:$0xff] }
 0x24e   : > { %1192 = vmatpush.msra.mxu0 %v1075_v39  ;;  %1232 = vmatpush.msrb.mxu1 %v1076_v40 }
 0x24f   : > { %1155 = vmatpush.msrb.mxu3 %v1062_v50  ;;  %v992_v50 = vld [vmem:[#allocation14 + $0x1e0] sm:$0xff] }
 0x250   : > { %1193 = vmatpush.msra.mxu0 %v1071_v43  ;;  %1233 = vmatpush.msrb.mxu1 %v1072_v44 }
 0x251   : > { %1156 = vmatpush.msrb.mxu3 %v1058_v53  ;;  %v1010_v53 = vld [vmem:[#allocation14 + $0x270] sm:$0xff] }
 0x252   : > { %1194 = vmatpush.msra.mxu0 %v1067_v47  ;;  %1234 = vmatpush.msrb.mxu1 %v1068_v48 }
 0x254   : > { %1195 = vmatpush.msra.mxu0 %v1063_v51  ;;  %1235 = vmatpush.msrb.mxu1 %v1064_v52  ;;  %v1008_v52 = vld [vmem:[#allocation14 + $0x260] sm:$0xff] }
 0x256   : > { %1196 = vmatpush.msra.mxu0 %v1059_v54  ;;  %1236 = vmatpush.msrb.mxu1 %v1060_v55  ;;  %v988_v54 = vld [vmem:[#allocation14 + $0x1c0] sm:$0xff] }
 0x257   : > { %v1004_v55 = vld [vmem:[#allocation14 + $0x240] sm:$0xff] }
 0x258   : > { %1237 = vmatpush.msrb.mxu1 %v1056_v59  ;;  %v1000_v59 = vld [vmem:[#allocation14 + $0x220] sm:$0xff] }
 0x2c0   : > { %v727_v57 = vpop.f32.mrf.mxu0  ;;  %v747_v58 = vpop.f32.mrf.mxu1 }
 0x2c5   : > { %v770_v60 = vpop.f32.mrf.mxu2  ;;  %v790_v61 = vpop.f32.mrf.mxu3 }
 0x2c6   : > { %v771_v62 = vadd.f32 %v770_v60, %v727_v57  ;;  %v791_v63 = vadd.f32 %v790_v61, %v747_v58  ;;  %v1054_v57 = vld [vmem:[#allocation14 + $0x3a8] sm:$0xff]  ;;  %v1055_v58 = vld [vmem:[#allocation14 + $0x3b0] sm:$0xff]  ;;  %v1033_v60 = vld [vmem:[#allocation14 + $0x300] sm:$0xff] }
 0x2c7   : > { %1157 = vmatpush.msrb.mxu3 %v1054_v57  ;;  %v1050_v61 = vld [vmem:[#allocation14 + $0x388] sm:$0xff]  ;;  %1197 = vmatpush.msra.mxu0 %v1055_v58  ;;  %v1006_v57 = vld [vmem:[#allocation14 + $0x250] sm:$0xff]  ;;  %v984_v58 = vld [vmem:[#allocation14 + $0x1a0] sm:$0xff] }
 0x2c8   : > { %v839_v2 = vpop.f32.mrf.mxu0  ;;  %v859_v3 = vpop.f32.mrf.mxu1  ;;  %1122 = vmatpush.msrb.mxu2 %v1033_v60  ;;  %v1001_v60 = vld [vmem:[#allocation14 + $0x228] sm:$0xff] }
 0x2c9   : > { %v862_v5 = vadd.f32 %v839_v2, %v771_v62  ;;  %v863_v6 = vadd.f32 %v859_v3, %v791_v63  ;;  %v1051_v63 = vld [vmem:[#allocation14 + $0x390] sm:$0xff]  ;;  %1158 = vmatpush.msrb.mxu3 %v1050_v61  ;;  %v1046_v2 = vld [vmem:[#allocation14 + $0x368] sm:$0xff] }
 0x2ca   : > { %v1047_v3 = vld [vmem:[#allocation14 + $0x370] sm:$0xff]  ;;  %1198 = vmatpush.msra.mxu0 %v1051_v63  ;;  %v996_v63 = vld [vmem:[#allocation14 + $0x200] sm:$0xff] }
 0x2cb   : > { %v870_v7 = vadd.f32 %v866_v0, %v862_v5  ;;  %v871_v8 = vadd.f32 %v867_v1, %v863_v6  ;;  %v1052_v0 = vld [vmem:[#allocation14 + $0x398] sm:$0xff]  ;;  %v1029_v1 = vld [vmem:[#allocation14 + $0x2e0] sm:$0xff]  ;;  %1159 = vmatpush.msrb.mxu3 %v1046_v2  ;;  %v1002_v61 = vld [vmem:[#allocation14 + $0x230] sm:$0xff] }
 0x2cc   : > { %v1048_v5 = vld [vmem:[#allocation14 + $0x378] sm:$0xff]  ;;  %1238 = vmatpush.msrb.mxu1 %v1052_v0  ;;  %v1025_v6 = vld [vmem:[#allocation14 + $0x2c0] sm:$0xff]  ;;  %1123 = vmatpush.msrb.mxu2 %v1029_v1  ;;  %v997_v0 = vld [vmem:[#allocation14 + $0x208] sm:$0xff] }
 0x2cd   : > { %v872_v9 = vmax.f32 %v870_v7, 0.0  ;;  %v873_v10 = vmax.f32 %v871_v8, 0.0  ;;  %v1042_v7 = vld [vmem:[#allocation14 + $0x348] sm:$0xff]  ;;  %v1043_v8 = vld [vmem:[#allocation14 + $0x350] sm:$0xff]  ;;  %1199 = vmatpush.msra.mxu0 %v1047_v3  ;;  %v976_v3 = vld [vmem:[#allocation14 + $0x160] sm:$0xff] }
 0x2ce   : > { %1239 = vmatpush.msrb.mxu1 %v1048_v5  ;;  %1124 = vmatpush.msrb.mxu2 %v1025_v6  ;;  %v998_v1 = vld [vmem:[#allocation14 + $0x210] sm:$0xff]  ;;  %v993_v2 = vld [vmem:[#allocation14 + $0x1e8] sm:$0xff]  ;;  %v995_v6 = vld [vmem:[#allocation14 + $0x1f8] sm:$0xff] }
 0x2cf   : > { %881 = vrot.lane.b32.xlu2 %v872_v9, %s2846_s24  ;;  %v900_v11 = vrot.slane %v873_v10, 1  ;;  %v894_v12 = vrot.slane %v872_v9, 1  ;;  %v918_v13 = vrot.slane %v872_v9, 3  ;;  %v912_v14 = vrot.slane %v873_v10, 2  ;;  %1160 = vmatpush.msrb.mxu3 %v1042_v7  ;;  %v994_v5 = vld [vmem:[#allocation14 + $0x1f0] sm:$0xff]  ;;  %v989_v7 = vld [vmem:[#allocation14 + $0x1c8] sm:$0xff] }
 0x2d0   : > { %v906_v15 = vrot.slane %v872_v9, 2  ;;  %v924_v16 = vrot.slane %v873_v10, 3  ;;  %v1044_v9 = vld [vmem:[#allocation14 + $0x358] sm:$0xff]  ;;  %1200 = vmatpush.msra.mxu0 %v1043_v8  ;;  %v972_v8 = vld [vmem:[#allocation14 + $0x140] sm:$0xff] }
 0x2d1   : > { %901 = vrot.lane.b32.xlu1 %v900_v11, %s2846_s24  ;;  %895 = vrot.lane.b32.xlu0 %v894_v12, %s2846_s24  ;;  %v1038_v11 = vld [vmem:[#allocation14 + $0x328] sm:$0xff]  ;;  %v1039_v12 = vld [vmem:[#allocation14 + $0x330] sm:$0xff] }
 0x2d2   : > { %1240 = vmatpush.msrb.mxu1 %v1044_v9  ;;  %1161 = vmatpush.msrb.mxu3 %v1038_v11  ;;  %v990_v9 = vld [vmem:[#allocation14 + $0x1d0] sm:$0xff]  ;;  %v985_v11 = vld [vmem:[#allocation14 + $0x1a8] sm:$0xff] }
 0x2d3   : > { %1201 = vmatpush.msra.mxu0 %v1039_v12  ;;  %v968_v12 = vld [vmem:[#allocation14 + $0x120] sm:$0xff] }
 0x2d5   : > { %1202 = vmatpush.msra.mxu0 %v1035_v17  ;;  %v982_v17 = vld [vmem:[#allocation14 + $0x190] sm:$0xff] }
 0x2d7   : > { %889 = vrot.lane.b32.xlu2 %v873_v10, %s2846_s24  ;;  %v1021_v10 = vld [vmem:[#allocation14 + $0x2a0] sm:$0xff]  ;;  %1203 = vmatpush.msra.mxu0 %v1031_v21 }
 0x2d8   : > { %1125 = vmatpush.msrb.mxu2 %v1021_v10  ;;  %v991_v10 = vld [vmem:[#allocation14 + $0x1d8] sm:$0xff] }
 0x2d9   : > { %919 = vrot.lane.b32.xlu1 %v918_v13, %s2846_s24  ;;  %913 = vrot.lane.b32.xlu0 %v912_v14, %s2846_s24  ;;  %v1040_v13 = vld [vmem:[#allocation14 + $0x338] sm:$0xff]  ;;  %v1017_v14 = vld [vmem:[#allocation14 + $0x280] sm:$0xff] }
 0x2da   : > { %1241 = vmatpush.msrb.mxu1 %v1040_v13  ;;  %1126 = vmatpush.msrb.mxu2 %v1017_v14  ;;  %v986_v13 = vld [vmem:[#allocation14 + $0x1b0] sm:$0xff]  ;;  %v987_v14 = vld [vmem:[#allocation14 + $0x1b8] sm:$0xff] }
 0x2db   : > { %1204 = vmatpush.msra.mxu0 %v1027_v25  ;;  %v973_v25 = vld [vmem:[#allocation14 + $0x148] sm:$0xff] }
 0x2dc   : > { %1242 = vmatpush.msrb.mxu1 %v1036_v18  ;;  %1263 = vmatpush.msra.mxu2 %v1096_v19  ;;  %v983_v18 = vld [vmem:[#allocation14 + $0x198] sm:$0xff]  ;;  %v960_v19 = vld [vmem:[#allocation14 + $0xe0] sm:$0xff] }
 0x2dd   : > { %1205 = vmatpush.msra.mxu0 %v1023_v29  ;;  %v969_v29 = vld [vmem:[#allocation14 + $0x128] sm:$0xff] }
 0x2de   : > { %1243 = vmatpush.msrb.mxu1 %v1032_v22  ;;  %1264 = vmatpush.msra.mxu2 %v1092_v23  ;;  %v978_v22 = vld [vmem:[#allocation14 + $0x170] sm:$0xff]  ;;  %v979_v23 = vld [vmem:[#allocation14 + $0x178] sm:$0xff] }
 0x2df   : > { %907 = vrot.lane.b32.xlu2 %v906_v15, %s2846_s24  ;;  %v1034_v15 = vld [vmem:[#allocation14 + $0x308] sm:$0xff]  ;;  %1206 = vmatpush.msra.mxu0 %v1019_v34  ;;  %v966_v34 = vld [vmem:[#allocation14 + $0x110] sm:$0xff] }
 0x2e0   : > { %1162 = vmatpush.msrb.mxu3 %v1034_v15  ;;  %1244 = vmatpush.msrb.mxu1 %v1028_v26  ;;  %v981_v15 = vld [vmem:[#allocation14 + $0x188] sm:$0xff]  ;;  %v974_v26 = vld [vmem:[#allocation14 + $0x150] sm:$0xff] }
 0x2e1   : > { %1265 = vmatpush.msra.mxu2 %v1088_v27  ;;  %v975_v27 = vld [vmem:[#allocation14 + $0x158] sm:$0xff] }
 0x2e2   : > { %1163 = vmatpush.msrb.mxu3 %v1030_v20  ;;  %1245 = vmatpush.msrb.mxu1 %v1024_v30  ;;  %v977_v20 = vld [vmem:[#allocation14 + $0x168] sm:$0xff]  ;;  %v970_v30 = vld [vmem:[#allocation14 + $0x130] sm:$0xff] }
 0x2e3   : > { %1266 = vmatpush.msra.mxu2 %v1084_v31  ;;  %v971_v31 = vld [vmem:[#allocation14 + $0x138] sm:$0xff] }
 0x2e4   : > { %1164 = vmatpush.msrb.mxu3 %v1026_v24  ;;  %1246 = vmatpush.msrb.mxu1 %v1020_v35  ;;  %v956_v24 = vld [vmem:[#allocation14 + $0xc0] sm:$0xff]  ;;  %v967_v35 = vld [vmem:[#allocation14 + $0x118] sm:$0xff] }
 0x2e6   : > { %1165 = vmatpush.msrb.mxu3 %v1022_v28  ;;  %v952_v28 = vld [vmem:[#allocation14 + $0xa0] sm:$0xff] }
 0x2e7   : > { %925 = vrot.lane.b32.xlu2 %v924_v16, %s2846_s24 }
 0x2e8   : > { %1166 = vmatpush.msrb.mxu3 %v1018_v33  ;;  %v965_v33 = vld [vmem:[#allocation14 + $0x108] sm:$0xff] }
 0x329   : > { %v882_v62 = vpop.permute.xlu2 %881 }
 0x32a   : > { %885 = vst.msk [vmem:[#allocation4 + $0x1] sm:$0x1] %vm884_vm11, %v882_v62 }
 0x32b   : > { %887 = vst.msk [vmem:[#allocation4 + $0x9] sm:$0x1] %vm886_vm12, %v882_v62  ;;  %v980_v62 = vld [vmem:[#allocation14 + $0x180] sm:$0xff] }
 0x331   : > { %v890_v16 = vpop.permute.xlu2 %889 }
 0x332   : > { %892 = vst.msk [vmem:[#allocation4 + $0x2] sm:$0x1] %vm884_vm11, %v890_v16 }
 0x333   : > { %893 = vst.msk [vmem:[#allocation4 + $0xa] sm:$0x1] %vm886_vm12, %v890_v16  ;;  %v964_v16 = vld [vmem:[#allocation14 + $0x100] sm:$0xff] }
 0x339   : > { %v908_v32 = vpop.permute.xlu2 %907 }
 0x33a   : > { %910 = vst.msk [vmem:[#allocation4 + $0x5] sm:$0x1] %vm884_vm11, %v908_v32 }
 0x33b   : > { %911 = vst.msk [vmem:[#allocation4 + $0xd] sm:$0x1] %vm886_vm12, %v908_v32  ;;  %v948_v32 = vld [vmem:[#allocation14 + $0x80] sm:$0xff] }
 0x341   : > { %v926_v36 = vpop.permute.xlu2 %925 }
 0x342   : > { %928 = vst.msk [vmem:[#allocation4 + $0x10] sm:$0x1] %vm884_vm11, %v926_v36 }
 0x343   : > { %929 = vst.msk [vmem:[#allocation4 + $0x18] sm:$0x1] %vm886_vm12, %v926_v36  ;;  %v902_v37 = vpop.permute.xlu1 %901  ;;  %v896_v38 = vpop.permute.xlu0 %895  ;;  %v944_v36 = vld [vmem:[#allocation14 + $0x60] sm:$0xff] }
 0x344   : > { %904 = vst.msk [vmem:[#allocation4 + $0x4] sm:$0x1] %vm884_vm11, %v902_v37 }
 0x345   : > { %905 = vst.msk [vmem:[#allocation4 + $0xc] sm:$0x1] %vm886_vm12, %v902_v37  ;;  %v961_v37 = vld [vmem:[#allocation14 + $0xe8] sm:$0xff] }
 0x346   : > { %898 = vst.msk [vmem:[#allocation4 + $0x3] sm:$0x1] %vm884_vm11, %v896_v38 }
 0x347   : > { %899 = vst.msk [vmem:[#allocation4 + $0xb] sm:$0x1] %vm886_vm12, %v896_v38  ;;  %v962_v38 = vld [vmem:[#allocation14 + $0xf0] sm:$0xff] }
 0x349   : > { %v1014_v41 = vld [vmem:[#allocation4 + $0x10] sm:$0x1] }
 0x34a   : > { %v1015_v42 = vld [vmem:[#allocation4 + $0x18] sm:$0x1]  ;;  %v1103_v45 = vrot.slane %v1014_v41, 1 }
 0x34b   : > { %v920_v39 = vpop.permute.xlu1 %919  ;;  %v914_v40 = vpop.permute.xlu0 %913  ;;  %v1106_v48 = vrot.slane %v1015_v42, 1  ;;  %v957_v41 = vld [vmem:[#allocation14 + $0xc8] sm:$0xff]  ;;  %v958_v42 = vld [vmem:[#allocation14 + $0xd0] sm:$0xff] }
 0x34c   : > { %922 = vst.msk [vmem:[#allocation4 + $0x7] sm:$0x1] %vm884_vm11, %v920_v39 }
 0x34d   : > { %923 = vst.msk [vmem:[#allocation4 + $0xf] sm:$0x1] %vm886_vm12, %v920_v39  ;;  %v963_v39 = vld [vmem:[#allocation14 + $0xf8] sm:$0xff] }
 0x34e   : > { %916 = vst.msk [vmem:[#allocation4 + $0x6] sm:$0x1] %vm884_vm11, %v914_v40 }
 0x34f   : > { %917 = vst.msk [vmem:[#allocation4 + $0xe] sm:$0x1] %vm886_vm12, %v914_v40  ;;  %v940_v40 = vld [vmem:[#allocation14 + $0x40] sm:$0xff] }
 0x355   : > { %v1012_v43 = vld [vmem:[#allocation4] sm:$0xfe] }
 0x356   : > { %v1102_v44 = vrot.slane %v1012_v43, 1  ;;  %v1013_v46 = vld [vmem:[#allocation4 + $0x8] sm:$0xfe] }
 0x357   : > { %v1105_v47 = vrot.slane %v1013_v46, 1  ;;  %v3049_v21 = vld [vmem:[#allocation4 + $0x8] sm:$0xff]  ;;  %v954_v46 = vld [vmem:[#allocation14 + $0xb0] sm:$0xff] }
 0x358   : > { %v1104_v49 = vsel %vm1101_vm13, %v1102_v44, %v1103_v45  ;;  %v959_v43 = vld [vmem:[#allocation14 + $0xd8] sm:$0xff]  ;;  %v936_v44 = vld [vmem:[#allocation14 + $0x20] sm:$0xff]  ;;  %v953_v45 = vld [vmem:[#allocation14 + $0xa8] sm:$0xff] }
 0x359   : > { %1127 = vmatmul.f32.vlgmr.msrb.gmra.mxu2 %v1104_v49  ;;  %v1107_v51 = vsel %vm1101_vm13, %v1105_v47, %v1106_v48  ;;  %v955_v47 = vld [vmem:[#allocation14 + $0xb8] sm:$0xff]  ;;  %v932_v48 = vld [vmem:[#allocation14] sm:$0xff] }
 0x35a   : > { %2486 = vmatmul.msk.f32.vlgmr.msra.gmra.mxu3 %vm875_vm9, %v1107_v51  ;;  %2487 = vmatmul.msk.f32.vlgmr.msrb.gmra.mxu0 %vm875_vm9, %v1107_v51 }
 0x35b   : > { %2488 = vmatmul.msk.f32.vlgmr.msra.gmra.mxu1 %vm875_vm9, %v1107_v51  ;;  %1274 = vmatpush.msrb.mxu2 %v992_v50  ;;  %v950_v50 = vld [vmem:[#allocation14 + $0x90] sm:$0xff] }
 0x35c   : > { %1306 = vmatpush.msra.mxu3 %v1008_v52  ;;  %1346 = vmatpush.msrb.mxu0 %v1009_v4  ;;  %v945_v52 = vld [vmem:[#allocation14 + $0x68] sm:$0xff]  ;;  %v1011_v4 = vld [vmem:[#allocation14 + $0x278] sm:$0xff] }
 0x35d   : > { %1386 = vmatpush.msra.mxu1 %v1010_v53  ;;  %1275 = vmatpush.msrb.mxu2 %v988_v54  ;;  %v946_v53 = vld [vmem:[#allocation14 + $0x70] sm:$0xff] }
 0x35e   : > { %1307 = vmatpush.msra.mxu3 %v1004_v55  ;;  %1347 = vmatpush.msrb.mxu0 %v1005_v56  ;;  %v930_v54 = vld [vmem:[#allocation4] sm:$0xff]  ;;  %v941_v56 = vld [vmem:[#allocation14 + $0x48] sm:$0xff] }
 0x35f   : > { %1387 = vmatpush.msra.mxu1 %v1006_v57  ;;  %1276 = vmatpush.msrb.mxu2 %v984_v58  ;;  %v947_v55 = vld [vmem:[#allocation14 + $0x78] sm:$0xff]  ;;  %v942_v58 = vld [vmem:[#allocation14 + $0x50] sm:$0xff] }
 0x360   : > { %1308 = vmatpush.msra.mxu3 %v1000_v59  ;;  %1348 = vmatpush.msrb.mxu0 %v1001_v60  ;;  %v1007_v57 = vld [vmem:[#allocation14 + $0x258] sm:$0xff]  ;;  %v937_v60 = vld [vmem:[#allocation14 + $0x28] sm:$0xff] }
 0x361   : > { %1388 = vmatpush.msra.mxu1 %v1002_v61  ;;  %1277 = vmatpush.msrb.mxu2 %v980_v62  ;;  %v943_v59 = vld [vmem:[#allocation14 + $0x58] sm:$0xff]  ;;  %v938_v62 = vld [vmem:[#allocation14 + $0x30] sm:$0xff] }
 0x362   : > { %1309 = vmatpush.msra.mxu3 %v996_v63  ;;  %1349 = vmatpush.msrb.mxu0 %v997_v0  ;;  %v1003_v61 = vld [vmem:[#allocation14 + $0x238] sm:$0xff]  ;;  %v933_v0 = vld [vmem:[#allocation14 + $0x8] sm:$0xff] }
 0x363   : > { %1389 = vmatpush.msra.mxu1 %v998_v1  ;;  %1167 = vmatmul.f32.vlgmr.msrb.gmra.mxu3 %v1104_v49  ;;  %v939_v63 = vld [vmem:[#allocation14 + $0x38] sm:$0xff] }
 0x364   : > { %1207 = vmatmul.f32.vlgmr.msra.gmra.mxu0 %v1104_v49  ;;  %1247 = vmatmul.f32.vlgmr.msrb.gmra.mxu1 %v1104_v49  ;;  %v949_v49 = vld [vmem:[#allocation14 + $0x88] sm:$0xff]  ;;  %v999_v1 = vld [vmem:[#allocation14 + $0x218] sm:$0xff] }
 0x365   : > { %2489 = vmatmul.msk.f32.vlgmr.msra.gmra.mxu2 %vm875_vm9, %v1107_v51  ;;  %1314 = vmatpush.msrb.mxu3 %v993_v2  ;;  %v951_v51 = vld [vmem:[#allocation14 + $0x98] sm:$0xff]  ;;  %v934_v2 = vld [vmem:[#allocation14 + $0x10] sm:$0xff] }
 0x366   : > { %1278 = vmatpush.msrb.mxu2 %v976_v3  ;;  %1354 = vmatpush.msra.mxu0 %v994_v5  ;;  %v935_v3 = vld [vmem:[#allocation14 + $0x18] sm:$0xff]  ;;  %v1499_v5 = vld [vmem:[#allocation14 + $0x6e0] sm:$0xff] }
 0x367   : > { %1394 = vmatpush.msrb.mxu1 %v995_v6  ;;  %1315 = vmatpush.msrb.mxu3 %v989_v7  ;;  %v1515_v6 = vld [vmem:[#allocation14 + $0x760] sm:$0xff]  ;;  %v1516_v7 = vld [vmem:[#allocation14 + $0x768] sm:$0xff] }
 0x368   : > { %1279 = vmatpush.msrb.mxu2 %v972_v8  ;;  %1355 = vmatpush.msra.mxu0 %v990_v9  ;;  %v1517_v8 = vld [vmem:[#allocation14 + $0x770] sm:$0xff]  ;;  %v1495_v9 = vld [vmem:[#allocation14 + $0x6c0] sm:$0xff] }
 0x369   : > { %1395 = vmatpush.msrb.mxu1 %v991_v10  ;;  %1316 = vmatpush.msrb.mxu3 %v985_v11  ;;  %v1511_v10 = vld [vmem:[#allocation14 + $0x740] sm:$0xff]  ;;  %v1512_v11 = vld [vmem:[#allocation14 + $0x748] sm:$0xff] }
 0x36a   : > { %1280 = vmatpush.msrb.mxu2 %v968_v12  ;;  %1356 = vmatpush.msra.mxu0 %v986_v13  ;;  %v1513_v12 = vld [vmem:[#allocation14 + $0x750] sm:$0xff]  ;;  %v1491_v13 = vld [vmem:[#allocation14 + $0x6a0] sm:$0xff] }
 0x36b   : > { %1396 = vmatpush.msrb.mxu1 %v987_v14  ;;  %1317 = vmatpush.msrb.mxu3 %v981_v15  ;;  %v1507_v14 = vld [vmem:[#allocation14 + $0x720] sm:$0xff]  ;;  %v1508_v15 = vld [vmem:[#allocation14 + $0x728] sm:$0xff] }
 0x36c   : > { %1281 = vmatpush.msrb.mxu2 %v964_v16  ;;  %1357 = vmatpush.msra.mxu0 %v982_v17  ;;  %v1435_v16 = vld [vmem:[#allocation4 + $0x8] sm:$0xfc]  ;;  %v1509_v17 = vld [vmem:[#allocation14 + $0x730] sm:$0xff] }
 0x36d   : > { %1397 = vmatpush.msrb.mxu1 %v983_v18  ;;  %2490 = vmatmul.msk.f32.vlgmr.msra.gmra.mxu3 %vm875_vm9, %v3049_v21  ;;  %v1487_v18 = vld [vmem:[#allocation14 + $0x680] sm:$0xff] }
 0x36e   : > { %1282 = vmatpush.msrb.mxu2 %v960_v19  ;;  %1318 = vmatpush.msrb.mxu3 %v977_v20  ;;  %v1503_v19 = vld [vmem:[#allocation14 + $0x700] sm:$0xff]  ;;  %v1504_v20 = vld [vmem:[#allocation14 + $0x708] sm:$0xff] }
 0x36f   : > { %2491 = vmatmul.msk.f32.vlgmr.msrb.gmra.mxu0 %vm875_vm9, %v3049_v21  ;;  %2492 = vmatmul.msk.f32.vlgmr.msra.gmra.mxu1 %vm875_vm9, %v3049_v21 }
 0x370   : > { %1358 = vmatpush.msra.mxu0 %v978_v22  ;;  %1398 = vmatpush.msrb.mxu1 %v979_v23  ;;  %v1505_v22 = vld [vmem:[#allocation14 + $0x710] sm:$0xff]  ;;  %v1483_v23 = vld [vmem:[#allocation14 + $0x660] sm:$0xff] }
 0x371   : > { %1283 = vmatpush.msrb.mxu2 %v956_v24  ;;  %1319 = vmatpush.msrb.mxu3 %v973_v25  ;;  %v1527_v24 = vrot.slane %v1435_v16, 2  ;;  %v1500_v25 = vld [vmem:[#allocation14 + $0x6e8] sm:$0xff]  ;;  %v1454_v16 = vld [vmem:[#allocation14 + $0x578] sm:$0xff] }
 0x372   : > { %1359 = vmatpush.msra.mxu0 %v974_v26  ;;  %1399 = vmatpush.msrb.mxu1 %v975_v27  ;;  %v1501_v26 = vld [vmem:[#allocation14 + $0x6f0] sm:$0xff]  ;;  %v1502_v27 = vld [vmem:[#allocation14 + $0x6f8] sm:$0xff] }
 0x373   : > { %1284 = vmatpush.msrb.mxu2 %v952_v28  ;;  %1320 = vmatpush.msrb.mxu3 %v969_v29 }
 0x374   : > { %1360 = vmatpush.msra.mxu0 %v970_v30  ;;  %1400 = vmatpush.msrb.mxu1 %v971_v31  ;;  %v1479_v30 = vld [vmem:[#allocation14 + $0x640] sm:$0xff]  ;;  %v1496_v31 = vld [vmem:[#allocation14 + $0x6c8] sm:$0xff] }
 0x375   : > { %1285 = vmatpush.msrb.mxu2 %v948_v32  ;;  %1321 = vmatpush.msrb.mxu3 %v965_v33  ;;  %v1497_v32 = vld [vmem:[#allocation14 + $0x6d0] sm:$0xff]  ;;  %v1498_v33 = vld [vmem:[#allocation14 + $0x6d8] sm:$0xff] }
 0x376   : > { %1361 = vmatpush.msra.mxu0 %v966_v34  ;;  %1401 = vmatpush.msrb.mxu1 %v967_v35  ;;  %v1475_v34 = vld [vmem:[#allocation14 + $0x620] sm:$0xff]  ;;  %v1492_v35 = vld [vmem:[#allocation14 + $0x6a8] sm:$0xff] }
 0x377   : > { %1286 = vmatpush.msrb.mxu2 %v944_v36  ;;  %1322 = vmatpush.msrb.mxu3 %v961_v37  ;;  %v1493_v36 = vld [vmem:[#allocation14 + $0x6b0] sm:$0xff]  ;;  %v1494_v37 = vld [vmem:[#allocation14 + $0x6b8] sm:$0xff] }
 0x378   : > { %1362 = vmatpush.msra.mxu0 %v962_v38  ;;  %1402 = vmatpush.msrb.mxu1 %v963_v39  ;;  %v1471_v38 = vld [vmem:[#allocation14 + $0x600] sm:$0xff]  ;;  %v1488_v39 = vld [vmem:[#allocation14 + $0x688] sm:$0xff] }
 0x379   : > { %1287 = vmatpush.msrb.mxu2 %v940_v40  ;;  %1323 = vmatpush.msrb.mxu3 %v957_v41  ;;  %v1489_v40 = vld [vmem:[#allocation14 + $0x690] sm:$0xff]  ;;  %v1490_v41 = vld [vmem:[#allocation14 + $0x698] sm:$0xff] }
 0x37a   : > { %1363 = vmatpush.msra.mxu0 %v958_v42  ;;  %1403 = vmatpush.msrb.mxu1 %v959_v43  ;;  %v1467_v42 = vld [vmem:[#allocation14 + $0x5e0] sm:$0xff]  ;;  %v1484_v43 = vld [vmem:[#allocation14 + $0x668] sm:$0xff] }
 0x37b   : > { %1288 = vmatpush.msrb.mxu2 %v936_v44  ;;  %1324 = vmatpush.msrb.mxu3 %v953_v45  ;;  %v1485_v44 = vld [vmem:[#allocation14 + $0x670] sm:$0xff]  ;;  %v1486_v45 = vld [vmem:[#allocation14 + $0x678] sm:$0xff] }
 0x37c   : > { %1364 = vmatpush.msra.mxu0 %v954_v46  ;;  %1404 = vmatpush.msrb.mxu1 %v955_v47  ;;  %v1463_v46 = vld [vmem:[#allocation14 + $0x5c0] sm:$0xff]  ;;  %v1480_v47 = vld [vmem:[#allocation14 + $0x648] sm:$0xff] }
 0x37d   : > { %1289 = vmatpush.msrb.mxu2 %v932_v48  ;;  %1325 = vmatpush.msrb.mxu3 %v949_v49  ;;  %v1481_v48 = vld [vmem:[#allocation14 + $0x650] sm:$0xff]  ;;  %v1482_v49 = vld [vmem:[#allocation14 + $0x658] sm:$0xff] }
 0x37e   : > { %1365 = vmatpush.msra.mxu0 %v950_v50  ;;  %1405 = vmatpush.msrb.mxu1 %v951_v51  ;;  %v1459_v50 = vld [vmem:[#allocation14 + $0x5a0] sm:$0xff]  ;;  %v1476_v51 = vld [vmem:[#allocation14 + $0x628] sm:$0xff] }
 0x37f   : > { %1290 = vmatmul.f32.vlgmr.msrb.gmra.mxu2 %v930_v54  ;;  %1326 = vmatpush.msrb.mxu3 %v945_v52  ;;  %v1477_v52 = vld [vmem:[#allocation14 + $0x630] sm:$0xff] }
 0x380   : > { %1426 = vmatpush.msra.mxu2 %v1011_v4  ;;  %1366 = vmatpush.msra.mxu0 %v946_v53  ;;  %v1478_v4 = vld [vmem:[#allocation14 + $0x638] sm:$0xff]  ;;  %v1455_v53 = vld [vmem:[#allocation14 + $0x580] sm:$0xff] }
 0x381   : > { %1406 = vmatpush.msrb.mxu1 %v947_v55  ;;  %1327 = vmatpush.msrb.mxu3 %v941_v56  ;;  %v1473_v55 = vld [vmem:[#allocation14 + $0x610] sm:$0xff]  ;;  %v1474_v56 = vld [vmem:[#allocation14 + $0x618] sm:$0xff] }
 0x382   : > { %1427 = vmatpush.msra.mxu2 %v1007_v57  ;;  %1367 = vmatpush.msra.mxu0 %v942_v58  ;;  %v1451_v57 = vld [vmem:[#allocation14 + $0x560] sm:$0xff]  ;;  %v1468_v58 = vld [vmem:[#allocation14 + $0x5e8] sm:$0xff] }
 0x383   : > { %1407 = vmatpush.msrb.mxu1 %v943_v59  ;;  %1328 = vmatpush.msrb.mxu3 %v937_v60  ;;  %v1469_v59 = vld [vmem:[#allocation14 + $0x5f0] sm:$0xff]  ;;  %v1470_v60 = vld [vmem:[#allocation14 + $0x5f8] sm:$0xff] }
 0x384   : > { %1428 = vmatpush.msra.mxu2 %v1003_v61  ;;  %1368 = vmatpush.msra.mxu0 %v938_v62  ;;  %v1447_v61 = vld [vmem:[#allocation14 + $0x540] sm:$0xff]  ;;  %v1464_v62 = vld [vmem:[#allocation14 + $0x5c8] sm:$0xff] }
 0x385   : > { %1408 = vmatpush.msrb.mxu1 %v939_v63  ;;  %1329 = vmatpush.msrb.mxu3 %v933_v0  ;;  %v1465_v63 = vld [vmem:[#allocation14 + $0x5d0] sm:$0xff]  ;;  %v1466_v0 = vld [vmem:[#allocation14 + $0x5d8] sm:$0xff] }
 0x386   : > { %1429 = vmatpush.msra.mxu2 %v999_v1  ;;  %1369 = vmatpush.msra.mxu0 %v934_v2  ;;  %v1434_v1 = vld [vmem:[#allocation4] sm:$0xfc]  ;;  %v1443_v2 = vld [vmem:[#allocation14 + $0x520] sm:$0xff] }
 0x387   : > { %1409 = vmatpush.msrb.mxu1 %v935_v3  ;;  %1330 = vmatmul.f32.vlgmr.msrb.gmra.mxu3 %v930_v54  ;;  %v1460_v3 = vld [vmem:[#allocation14 + $0x5a8] sm:$0xff] }
 0x388   : > { %1533 = vmatpush.msrb.mxu2 %v1499_v5  ;;  %1370 = vmatmul.f32.vlgmr.msra.gmra.mxu0 %v930_v54  ;;  %v1461_v5 = vld [vmem:[#allocation14 + $0x5b0] sm:$0xff] }
 0x389   : > { %1410 = vmatmul.f32.vlgmr.msrb.gmra.mxu1 %v930_v54  ;;  %2493 = vmatmul.msk.f32.vlgmr.msra.gmra.mxu2 %vm875_vm9, %v3049_v21  ;;  %v1437_v21 = vld [vmem:[#allocation4 + $0x18] sm:$0x3] }
 0x38a   : > { %1565 = vmatpush.msra.mxu3 %v1515_v6  ;;  %1605 = vmatpush.msrb.mxu0 %v1516_v7  ;;  %v1528_v28 = vrot.slane %v1437_v21, 2  ;;  %v1472_v54 = vld [vmem:[#allocation14 + $0x608] sm:$0xff]  ;;  %v1462_v6 = vld [vmem:[#allocation14 + $0x5b8] sm:$0xff]  ;;  %v1436_v7 = vld [vmem:[#allocation4 + $0x10] sm:$0x3] }
 0x38b   : > { %1645 = vmatpush.msra.mxu1 %v1517_v8  ;;  %1534 = vmatpush.msrb.mxu2 %v1495_v9  ;;  %v1439_v8 = vld [vmem:[#allocation14 + $0x500] sm:$0xff]  ;;  %v1456_v9 = vld [vmem:[#allocation14 + $0x588] sm:$0xff]  ;;  %v1450_v21 = vld [vmem:[#allocation14 + $0x558] sm:$0xff] }
 0x38c   : > { %1566 = vmatpush.msra.mxu3 %v1511_v10  ;;  %1606 = vmatpush.msrb.mxu0 %v1512_v11  ;;  %v3060_v29 = vsel %vm1523_vm14, %v1527_v24, %v1528_v28  ;;  %v1524_v10 = vrot.slane %v1434_v1, 2  ;;  %v1457_v11 = vld [vmem:[#allocation14 + $0x590] sm:$0xff] }
 0x38d   : > { %1646 = vmatpush.msra.mxu1 %v1513_v12  ;;  %1535 = vmatpush.msrb.mxu2 %v1491_v13  ;;  %v1458_v12 = vld [vmem:[#allocation14 + $0x598] sm:$0xff]  ;;  %v1525_v13 = vrot.slane %v1436_v7, 2  ;;  %v1445_v24 = vld [vmem:[#allocation14 + $0x530] sm:$0xff] }
 0x38e   : > { %1567 = vmatpush.msra.mxu3 %v1507_v14  ;;  %1607 = vmatpush.msrb.mxu0 %v1508_v15  ;;  %v1452_v14 = vld [vmem:[#allocation14 + $0x568] sm:$0xff]  ;;  %v1453_v15 = vld [vmem:[#allocation14 + $0x570] sm:$0xff] }
 0x38f   : > { %1647 = vmatpush.msra.mxu1 %v1509_v17  ;;  %1536 = vmatpush.msrb.mxu2 %v1487_v18  ;;  %v1526_v17 = vsel %vm1523_vm14, %v1524_v10, %v1525_v13  ;;  %v1518_v18 = vld [vmem:[#allocation14 + $0x778] sm:$0xff]  ;;  %v1441_v28 = vld [vmem:[#allocation14 + $0x510] sm:$0xff] }
 0x390   : > { %1568 = vmatpush.msra.mxu3 %v1503_v19  ;;  %1608 = vmatpush.msrb.mxu0 %v1504_v20  ;;  %v1448_v19 = vld [vmem:[#allocation14 + $0x548] sm:$0xff]  ;;  %v1449_v20 = vld [vmem:[#allocation14 + $0x550] sm:$0xff] }
 0x391   : > { %1648 = vmatpush.msra.mxu1 %v1505_v22  ;;  %1537 = vmatpush.msrb.mxu2 %v1483_v23  ;;  %v1514_v22 = vld [vmem:[#allocation14 + $0x758] sm:$0xff]  ;;  %v1444_v23 = vld [vmem:[#allocation14 + $0x528] sm:$0xff] }
 0x392   : > { %1573 = vmatpush.msrb.mxu3 %v1500_v25  ;;  %1613 = vmatpush.msra.mxu0 %v1501_v26  ;;  %v1446_v25 = vld [vmem:[#allocation14 + $0x538] sm:$0xff] }
 0x393   : > { %1653 = vmatpush.msrb.mxu1 %v1502_v27  ;;  %2494 = vmatmul.msk.f32.vlgmr.msra.gmra.mxu3 %vm875_vm9, %v3060_v29  ;;  %v1510_v26 = vld [vmem:[#allocation14 + $0x738] sm:$0xff]  ;;  %v1440_v27 = vld [vmem:[#allocation14 + $0x508] sm:$0xff] }
 0x394   : > { %2495 = vmatmul.msk.f32.vlgmr.msrb.gmra.mxu0 %vm875_vm9, %v3060_v29  ;;  %2496 = vmatmul.msk.f32.vlgmr.msra.gmra.mxu1 %vm875_vm9, %v3060_v29 }
 0x395   : > { %1538 = vmatpush.msrb.mxu2 %v1479_v30  ;;  %1574 = vmatpush.msrb.mxu3 %v1496_v31  ;;  %v1442_v30 = vld [vmem:[#allocation14 + $0x518] sm:$0xff] }
 0x396   : > { %1614 = vmatpush.msra.mxu0 %v1497_v32  ;;  %1654 = vmatpush.msrb.mxu1 %v1498_v33  ;;  %v1506_v31 = vld [vmem:[#allocation14 + $0x718] sm:$0xff] }
 0x397   : > { %1539 = vmatpush.msrb.mxu2 %v1475_v34  ;;  %1575 = vmatpush.msrb.mxu3 %v1492_v35 }
 0x398   : > { %1615 = vmatpush.msra.mxu0 %v1493_v36  ;;  %1655 = vmatpush.msrb.mxu1 %v1494_v37 }
 0x399   : > { %1540 = vmatpush.msrb.mxu2 %v1471_v38  ;;  %1576 = vmatpush.msrb.mxu3 %v1488_v39 }
 0x39a   : > { %1616 = vmatpush.msra.mxu0 %v1489_v40  ;;  %1656 = vmatpush.msrb.mxu1 %v1490_v41 }
 0x39b   : > { %1541 = vmatpush.msrb.mxu2 %v1467_v42  ;;  %1577 = vmatpush.msrb.mxu3 %v1484_v43 }
 0x39c   : > { %1617 = vmatpush.msra.mxu0 %v1485_v44  ;;  %1657 = vmatpush.msrb.mxu1 %v1486_v45 }
 0x39d   : > { %1542 = vmatpush.msrb.mxu2 %v1463_v46  ;;  %1578 = vmatpush.msrb.mxu3 %v1480_v47 }
 0x39e   : > { %1618 = vmatpush.msra.mxu0 %v1481_v48  ;;  %1658 = vmatpush.msrb.mxu1 %v1482_v49 }
 0x39f   : > { %1543 = vmatpush.msrb.mxu2 %v1459_v50  ;;  %1579 = vmatpush.msrb.mxu3 %v1476_v51 }
 0x3a0   : > { %1619 = vmatpush.msra.mxu0 %v1477_v52  ;;  %1659 = vmatpush.msrb.mxu1 %v1478_v4 }
 0x3a1   : > { %1544 = vmatpush.msrb.mxu2 %v1455_v53  ;;  %1580 = vmatpush.msrb.mxu3 %v1472_v54 }
 0x3a2   : > { %1620 = vmatpush.msra.mxu0 %v1473_v55  ;;  %1660 = vmatpush.msrb.mxu1 %v1474_v56 }
 0x3a3   : > { %1545 = vmatpush.msrb.mxu2 %v1451_v57  ;;  %1581 = vmatpush.msrb.mxu3 %v1468_v58 }
 0x3a4   : > { %1621 = vmatpush.msra.mxu0 %v1469_v59  ;;  %1661 = vmatpush.msrb.mxu1 %v1470_v60 }
 0x3a5   : > { %1546 = vmatpush.msrb.mxu2 %v1447_v61  ;;  %1582 = vmatpush.msrb.mxu3 %v1464_v62 }
 0x3a6   : > { %1622 = vmatpush.msra.mxu0 %v1465_v63  ;;  %1662 = vmatpush.msrb.mxu1 %v1466_v0 }
 0x3a7   : > { %1547 = vmatpush.msrb.mxu2 %v1443_v2  ;;  %1583 = vmatpush.msrb.mxu3 %v1460_v3 }
 0x3a8   : > { %1623 = vmatpush.msra.mxu0 %v1461_v5  ;;  %1663 = vmatpush.msrb.mxu1 %v1462_v6 }
 0x3a9   : > { %1548 = vmatpush.msrb.mxu2 %v1439_v8  ;;  %1584 = vmatpush.msrb.mxu3 %v1456_v9 }
 0x3aa   : > { %1624 = vmatpush.msra.mxu0 %v1457_v11  ;;  %1664 = vmatpush.msrb.mxu1 %v1458_v12 }
 0x3ab   : > { %1549 = vmatmul.f32.vlgmr.msrb.gmra.mxu2 %v1526_v17  ;;  %1585 = vmatpush.msrb.mxu3 %v1452_v14 }
 0x3ac   : > { %1625 = vmatpush.msra.mxu0 %v1453_v15  ;;  %1665 = vmatpush.msrb.mxu1 %v1454_v16 }
 0x3ad   : > { %1685 = vmatpush.msra.mxu2 %v1518_v18  ;;  %1586 = vmatpush.msrb.mxu3 %v1448_v19 }
 0x3ae   : > { %1626 = vmatpush.msra.mxu0 %v1449_v20  ;;  %1666 = vmatpush.msrb.mxu1 %v1450_v21 }
 0x3af   : > { %1686 = vmatpush.msra.mxu2 %v1514_v22  ;;  %1587 = vmatpush.msrb.mxu3 %v1444_v23 }
 0x3b0   : > { %1627 = vmatpush.msra.mxu0 %v1445_v24  ;;  %1667 = vmatpush.msrb.mxu1 %v1446_v25 }
 0x3b1   : > { %1687 = vmatpush.msra.mxu2 %v1510_v26  ;;  %1588 = vmatpush.msrb.mxu3 %v1440_v27 }
 0x3b2   : > { %1628 = vmatpush.msra.mxu0 %v1441_v28  ;;  %1668 = vmatpush.msrb.mxu1 %v1442_v30 }
 0x3b3   : > { %1688 = vmatpush.msra.mxu2 %v1506_v31  ;;  %1589 = vmatmul.f32.vlgmr.msrb.gmra.mxu3 %v1526_v17 }
 0x3b4   : > { %1629 = vmatmul.f32.vlgmr.msra.gmra.mxu0 %v1526_v17  ;;  %1669 = vmatmul.f32.vlgmr.msrb.gmra.mxu1 %v1526_v17 }
 0x3b5   : > { %2497 = vmatmul.msk.f32.vlgmr.msra.gmra.mxu2 %vm875_vm9, %v3060_v29  ;;  %v1697_v29 = vld [vmem:[%s3235_s8] sm:$0xf] }
 0x3b6   : > { %v1699_v54 = vperm.slane %v1697_v29, 0  ;;  %v1700_v8 = vperm.slane %v1697_v29, 1  ;;  %v1701_v10 = vperm.slane %v1697_v29, 2  ;;  %v1702_v16 = vperm.slane %v1697_v29, 3 }
 0x3d7   : > { %v1188_v32 = vpop.f32.mrf.mxu0 }
 0x3d8   : > { %v1228_v34 = vpop.f32.mrf.mxu1 }
 0x3dc   : > { %v1128_v35 = vpop.f32.mrf.mxu2 }
 0x3dd   : > { %v1148_v33 = vpop.f32.mrf.mxu3 }
 0x3de   : > { %v1149_v48 = vadd.f32 %v1148_v33, %v1128_v35 }
 0x3e1   : > { %v1208_v36 = vpop.f32.mrf.mxu0  ;;  %v1248_v38 = vpop.f32.mrf.mxu1 }
 0x3e2   : > { %v1229_v56 = vadd.f32 %v1228_v34, %v1208_v36 }
 0x3e6   : > { %v1168_v37 = vpop.f32.mrf.mxu3 }
 0x3e7   : > { %v1189_v57 = vadd.f32 %v1188_v32, %v1168_v37 }
 0x3e8   : > { %v1268_v39 = vpop.f32.mrf.mxu2 }
 0x3e9   : > { %v1269_v63 = vadd.f32 %v1268_v39, %v1248_v38  ;;  %v1735_v39 = vlaneseq }
 0x3eb   : > { %vm1736_vm0 = vcmp.ge.s32.totalorder %v1735_v39, 16  ;;  %vm1737_vm1 = vcmp.lt.s32.totalorder %v1735_v39, 272  ;;  %v1982_v39 = vld [vmem:[#allocation16 + $0x178] sm:$0xff] }
 0x3ec   : > { %v1351_v40 = vpop.f32.mrf.mxu0  ;;  %v1391_v43 = vpop.f32.mrf.mxu1  ;;  %vm3123_vm3 = vmand %vm1736_vm0, %vm1737_vm1 }
 0x3f0   : > { %v1311_v41 = vpop.f32.mrf.mxu3 }
 0x402   : > { %v1291_v42 = vpop.f32.mrf.mxu2 }
 0x403   : > { %v1292_v50 = vadd.f32 %v1291_v42, %v1149_v48  ;;  %v1957_v48 = vld [vmem:[#allocation16 + $0xe8] sm:$0xff]  ;;  %v2211_v42 = vld [vmem:[#allocation16 + $0x2f0] sm:$0xff] }
 0x405   : > { %v1371_v44 = vpop.f32.mrf.mxu0  ;;  %v1312_v4 = vadd.f32 %v1311_v41, %v1292_v50  ;;  %v1955_v50 = vld [vmem:[#allocation16 + $0xd8] sm:$0xff] }
 0x406   : > { %v1411_v46 = vpop.f32.mrf.mxu1  ;;  %v1372_v60 = vadd.f32 %v1371_v44, %v1229_v56 }
 0x407   : > { %v1412_v2 = vadd.f32 %v1411_v46, %v1269_v63  ;;  %v1958_v46 = vld [vmem:[#allocation16 + $0xf0] sm:$0xff] }
 0x408   : > { %v1392_v5 = vadd.f32 %v1391_v43, %v1372_v60 }
 0x40a   : > { %v1331_v45 = vpop.f32.mrf.mxu3 }
 0x40b   : > { %v1332_v61 = vadd.f32 %v1331_v45, %v1189_v57  ;;  %v1959_v45 = vld [vmem:[#allocation16 + $0xf8] sm:$0xff] }
 0x40c   : > { %v1431_v47 = vpop.f32.mrf.mxu2  ;;  %2136 = vmatpush.msra.mxu1 %v1959_v45  ;;  %v1980_v45 = vld [vmem:[#allocation16 + $0x168] sm:$0xff] }
 0x40d   : > { %v1352_v6 = vadd.f32 %v1351_v40, %v1332_v61  ;;  %v1432_v9 = vadd.f32 %v1431_v47, %v1412_v2 }
 0x40e   : > { %2137 = vmatpush.msra.mxu1 %v1958_v46 }
 0x410   : > { %2138 = vmatpush.msra.mxu1 %v1957_v48 }
 0x411   : > { %v1610_v49 = vpop.f32.mrf.mxu0  ;;  %v1650_v55 = vpop.f32.mrf.mxu1 }
 0x416   : > { %v1570_v51 = vpop.f32.mrf.mxu3 }
 0x42e   : > { %v1550_v52 = vpop.f32.mrf.mxu2 }
 0x42f   : > { %v1571_v53 = vadd.f32 %v1570_v51, %v1550_v52  ;;  %v1954_v51 = vld [vmem:[#allocation16 + $0xd0] sm:$0xff] }
 0x431   : > { %v1693_v58 = vadd.f32 %v1571_v53, %v1312_v4  ;;  %v1630_v59 = vpop.f32.mrf.mxu0  ;;  %v1670_v11 = vpop.f32.mrf.mxu1 }
 0x432   : > { %v1651_v1 = vadd.f32 %v1650_v55, %v1630_v59  ;;  %v1952_v59 = vld [vmem:[#allocation16 + $0xc0] sm:$0xff] }
 0x433   : > { %v1707_v62 = vadd.f32 %v1699_v54, %v1693_v58  ;;  %v1953_v58 = vld [vmem:[#allocation16 + $0xc8] sm:$0xff] }
 0x434   : > { %v1695_v13 = vadd.f32 %v1651_v1, %v1392_v5  ;;  %v1949_v1 = vld [vmem:[#allocation16 + $0xa8] sm:$0xff]  ;;  %v1948_v5 = vld [vmem:[#allocation16 + $0xa0] sm:$0xff] }
 0x435   : > { %v3074_v0 = vmax.f32 %v1707_v62, 0.0  ;;  %v1951_v62 = vld [vmem:[#allocation16 + $0xb8] sm:$0xff] }
 0x436   : > { %v1590_v3 = vpop.f32.mrf.mxu3  ;;  %v1709_v19 = vadd.f32 %v1701_v10, %v1695_v13 }
 0x437   : > { %1754 = vst [vmem:[#allocation1] sm:$0xff] %v3074_v0  ;;  %v1611_v7 = vadd.f32 %v1610_v49, %v1590_v3  ;;  %v1956_v49 = vld [vmem:[#allocation16 + $0xe0] sm:$0xff] }
 0x438   : > { %v1690_v12 = vpop.f32.mrf.mxu2  ;;  %v3083_v24 = vmax.f32 %v1709_v19, 0.0  ;;  %2139 = vmatpush.msra.mxu1 %v1956_v49  ;;  %v1979_v49 = vld [vmem:[#allocation16 + $0x160] sm:$0xff] }
 0x439   : > { %v1694_v14 = vadd.f32 %v1611_v7, %v1352_v6  ;;  %v1691_v15 = vadd.f32 %v1690_v12, %v1670_v11  ;;  %v1947_v7 = vld [vmem:[#allocation16 + $0x98] sm:$0xff]  ;;  %v1944_v11 = vld [vmem:[#allocation16 + $0x80] sm:$0xff] }
 0x43a   : > { %2140 = vmatpush.msra.mxu1 %v1955_v50  ;;  %v1991_v50 = vld [vmem:[#allocation16 + $0x1c0] sm:$0xff] }
 0x43b   : > { %v1708_v17 = vadd.f32 %v1700_v8, %v1694_v14  ;;  %v1696_v18 = vadd.f32 %v1691_v15, %v1432_v9  ;;  %v1946_v8 = vld [vmem:[#allocation16 + $0x90] sm:$0xff]  ;;  %v1945_v9 = vld [vmem:[#allocation16 + $0x88] sm:$0xff] }
 0x43c   : > { %2141 = vmatpush.msra.mxu1 %v1954_v51  ;;  %v1978_v51 = vld [vmem:[#allocation16 + $0x158] sm:$0xff] }
 0x43d   : > { %v3077_v20 = vmax.f32 %v1708_v17, 0.0  ;;  %v1710_v21 = vadd.f32 %v1702_v16, %v1696_v18 }
 0x43e   : > { %2142 = vmatpush.msra.mxu1 %v1953_v58  ;;  %v1988_v58 = vld [vmem:[#allocation16 + $0x1a8] sm:$0xff] }
 0x43f   : > { %1755 = vst [vmem:[#allocation1 + $0x9] sm:$0xff] %v3077_v20  ;;  %v3080_v22 = vmax.f32 %v1710_v21, 0.0  ;;  %v1726_v23 = vrot.slane %v3077_v20, 7  ;;  %v2001_v21 = vld [vmem:[#allocation16 + $0x210] sm:$0xff] }
 0x440   : > { %2143 = vmatpush.msra.mxu1 %v1952_v59  ;;  %v2004_v59 = vld [vmem:[#allocation16 + $0x228] sm:$0xff] }
 0x441   : > { %v1744_v25 = vrot.slane %v3080_v22, 7  ;;  %v1728_v26 = vsel %vm1727_vm15, %v3074_v0, %v1726_v23  ;;  %v1986_v23 = vld [vmem:[#allocation16 + $0x198] sm:$0xff] }
 0x442   : > { %1729 = vrot.lane.b32.xlu0 %v1728_v26, %s2846_s24  ;;  %2144 = vmatpush.msra.mxu1 %v1951_v62  ;;  %v1987_v62 = vld [vmem:[#allocation16 + $0x1a0] sm:$0xff] }
 0x443   : > { %v1745_v27 = vsel %vm1727_vm15, %v3083_v24, %v1744_v25  ;;  %v2000_v25 = vld [vmem:[#allocation16 + $0x208] sm:$0xff]  ;;  %2039 = vmatpush.msrb.mxu2 %v1986_v23 }
 0x444   : > { %1746 = vrot.lane.b32.xlu1 %v1745_v27, %s2846_s24  ;;  %v1937_v23 = vld [vmem:[#allocation16 + $0x48] sm:$0xff] }
 0x446   : > { %v1757_v28 = vld [vmem:[#allocation1 + $0x1] ss:$9 sm:$0xff] }
 0x447   : > { %1766 = vst [vmem:[#allocation1] sm:$0xff] %v3083_v24  ;;  %1758 = vrot.lane.b32.xlu2 %v1757_v28, %s2846_s24  ;;  %v1999_v28 = vld [vmem:[#allocation16 + $0x200] sm:$0xff] }
 0x448   : > { %1767 = vst [vmem:[#allocation1 + $0x9] sm:$0xff] %v3080_v22 }
 0x44f   : > { %v1769_v30 = vld [vmem:[#allocation1 + $0x1] ss:$9 sm:$0xff] }
 0x450   : > { %1778 = vst [vmem:[#allocation1] sm:$0xff] %v3074_v0  ;;  %1770 = vrot.lane.b32.xlu0 %v1769_v30, %s2846_s24  ;;  %v1998_v30 = vld [vmem:[#allocation16 + $0x1f8] sm:$0xff] }
 0x451   : > { %1779 = vst [vmem:[#allocation1 + $0x9] sm:$0xff] %v3077_v20 }
 0x458   : > { %v1781_v31 = vld [vmem:[#allocation1 + $0x2] ss:$9 sm:$0xff] }
 0x459   : > { %1790 = vst [vmem:[#allocation1] sm:$0xff] %v3083_v24  ;;  %1782 = vrot.lane.b32.xlu1 %v1781_v31, %s2846_s24  ;;  %v1985_v31 = vld [vmem:[#allocation16 + $0x190] sm:$0xff] }
 0x45a   : > { %1791 = vst [vmem:[#allocation1 + $0x9] sm:$0xff] %v3080_v22  ;;  %2040 = vmatpush.msrb.mxu2 %v1985_v31  ;;  %v1935_v31 = vld [vmem:[#allocation16 + $0x38] sm:$0xff] }
 0x461   : > { %v1793_v32 = vld [vmem:[#allocation1 + $0x2] ss:$9 sm:$0xff] }
 0x462   : > { %1802 = vst [vmem:[#allocation1] sm:$0xff] %v3074_v0  ;;  %1794 = vrot.lane.b32.xlu2 %v1793_v32, %s2846_s24  ;;  %v1997_v32 = vld [vmem:[#allocation16 + $0x1f0] sm:$0xff] }
 0x463   : > { %1803 = vst [vmem:[#allocation1 + $0x9] sm:$0xff] %v3077_v20 }
 0x46a   : > { %v1805_v33 = vld [vmem:[#allocation1 + $0x3] ss:$9 sm:$0xff] }
 0x46b   : > { %1814 = vst [vmem:[#allocation1] sm:$0xff] %v3083_v24  ;;  %1806 = vrot.lane.b32.xlu0 %v1805_v33, %s2846_s24  ;;  %v1984_v33 = vld [vmem:[#allocation16 + $0x188] sm:$0xff] }
 0x46c   : > { %1815 = vst [vmem:[#allocation1 + $0x9] sm:$0xff] %v3080_v22  ;;  %2041 = vmatpush.msrb.mxu2 %v1984_v33  ;;  %v2196_v33 = vld [vmem:[#allocation16 + $0x278] sm:$0xff] }
 0x473   : > { %v1817_v34 = vld [vmem:[#allocation1 + $0x3] ss:$9 sm:$0xff] }
 0x474   : > { %1826 = vst [vmem:[#allocation1] sm:$0xff] %v3074_v0  ;;  %1818 = vrot.lane.b32.xlu1 %v1817_v34, %s2846_s24  ;;  %v1996_v34 = vld [vmem:[#allocation16 + $0x1e8] sm:$0xff] }
 0x475   : > { %1827 = vst [vmem:[#allocation1 + $0x9] sm:$0xff] %v3077_v20 }
 0x47c   : > { %v1829_v35 = vld [vmem:[#allocation1 + $0x4] ss:$9 sm:$0xff] }
 0x47d   : > { %1839 = vst [vmem:[#allocation1 + $0x9] sm:$0xff] %v3080_v22  ;;  %1830 = vrot.lane.b32.xlu2 %v1829_v35, %s2846_s24  ;;  %v1983_v35 = vld [vmem:[#allocation16 + $0x180] sm:$0xff] }
 0x47e   : > { %1838 = vst [vmem:[#allocation1] sm:$0xff] %v3083_v24  ;;  %2042 = vmatpush.msrb.mxu2 %v1983_v35 }
 0x480   : > { %2043 = vmatpush.msrb.mxu2 %v1982_v39  ;;  %v1932_v39 = vld [vmem:[#allocation16 + $0x20] sm:$0xff] }
 0x485   : > { %v1841_v36 = vld [vmem:[#allocation1 + $0x4] ss:$9 sm:$0xff] }
 0x486   : > { %1842 = vrot.lane.b32.xlu0 %v1841_v36, %s2846_s24  ;;  %1850 = vst [vmem:[#allocation1] sm:$0xff] %v3074_v0 }
 0x487   : > { %1851 = vst [vmem:[#allocation1 + $0x9] sm:$0xff] %v3077_v20 }
 0x48e   : > { %v1853_v37 = vld [vmem:[#allocation1 + $0x5] ss:$9 sm:$0xff] }
 0x48f   : > { %1854 = vrot.lane.b32.xlu1 %v1853_v37, %s2846_s24  ;;  %1862 = vst [vmem:[#allocation1] sm:$0xff] %v3083_v24  ;;  %v1995_v37 = vld [vmem:[#allocation16 + $0x1e0] sm:$0xff] }
 0x490   : > { %1863 = vst [vmem:[#allocation1 + $0x9] sm:$0xff] %v3080_v22 }
 0x497   : > { %v1865_v38 = vld [vmem:[#allocation1 + $0x5] ss:$9 sm:$0xff] }
 0x498   : > { %1866 = vrot.lane.b32.xlu2 %v1865_v38, %s2846_s24  ;;  %1874 = vst [vmem:[#allocation1] sm:$0xff] %v3074_v0 }
 0x499   : > { %1875 = vst [vmem:[#allocation1 + $0x9] sm:$0xff] %v3077_v20 }
 0x4a0   : > { %v1877_v40 = vld [vmem:[#allocation1 + $0x6] ss:$9 sm:$0xff] }
 0x4a1   : > { %1878 = vrot.lane.b32.xlu0 %v1877_v40, %s2846_s24  ;;  %1886 = vst [vmem:[#allocation1] sm:$0xff] %v3083_v24  ;;  %v1759_v41 = vpop.permute.xlu2 %1758 }
 0x4a2   : > { %1887 = vst [vmem:[#allocation1 + $0x9] sm:$0xff] %v3080_v22  ;;  %v1760_v43 = vrot.slane %v1759_v41, 7 }
 0x4a4   : > { %v1761_v44 = vsel %vm1732_vm2, %v1760_v43, %v1759_v41  ;;  %v1994_v41 = vld [vmem:[#allocation16 + $0x1d8] sm:$0xff]  ;;  %v1981_v43 = vld [vmem:[#allocation16 + $0x170] sm:$0xff] }
 0x4a5   : > { %1764 = vst.msk [vmem:[#allocation5 + $0x3] ss:$8 sm:$0x7] %vm3123_vm3, %v1761_v44  ;;  %v1993_v44 = vld [vmem:[#allocation16 + $0x1d0] sm:$0xff]  ;;  %2044 = vmatpush.msrb.mxu2 %v1981_v43 }
 0x4a7   : > { %2045 = vmatpush.msrb.mxu2 %v1980_v45  ;;  %v2192_v45 = vld [vmem:[#allocation16 + $0x258] sm:$0xff] }
 0x4a9   : > { %v1889_v47 = vld [vmem:[#allocation1 + $0x6] ss:$9 sm:$0xff]  ;;  %2046 = vmatpush.msrb.mxu2 %v1979_v49 }
 0x4aa   : > { %1890 = vrot.lane.b32.xlu1 %v1889_v47, %s2846_s24  ;;  %1898 = vst [vmem:[#allocation1] sm:$0xff] %v3074_v0  ;;  %v1950_v0 = vld [vmem:[#allocation16 + $0xb0] sm:$0xff]  ;;  %v1992_v47 = vld [vmem:[#allocation16 + $0x1c8] sm:$0xff] }
 0x4ab   : > { %1899 = vst [vmem:[#allocation1 + $0x9] sm:$0xff] %v3077_v20  ;;  %2145 = vmatpush.msra.mxu1 %v1950_v0  ;;  %v2002_v20 = vld [vmem:[#allocation16 + $0x218] sm:$0xff]  ;;  %2047 = vmatpush.msrb.mxu2 %v1978_v51  ;;  %v1929_v49 = vld [vmem:[#allocation16 + $0x8] sm:$0xff]  ;;  %v2189_v51 = vld [vmem:[#allocation16 + $0x240] sm:$0xff] }
 0x4ac   : > { %2062 = vmatpush.msra.mxu3 %v2002_v20  ;;  %v1974_v0 = vld [vmem:[#allocation16 + $0x138] sm:$0xff]  ;;  %v2199_v20 = vld [vmem:[#allocation16 + $0x290] sm:$0xff] }
 0x4ad   : > { %2146 = vmatpush.msra.mxu1 %v1949_v1  ;;  %v1943_v1 = vld [vmem:[#allocation16 + $0x78] sm:$0xff] }
 0x4ae   : > { %2063 = vmatpush.msra.mxu3 %v2001_v21 }
 0x4af   : > { %2147 = vmatpush.msra.mxu1 %v1948_v5  ;;  %v1973_v5 = vld [vmem:[#allocation16 + $0x130] sm:$0xff] }
 0x4b0   : > { %2064 = vmatpush.msra.mxu3 %v2000_v25  ;;  %v1961_v25 = vld [vmem:[#allocation16 + $0x108] sm:$0xff] }
 0x4b1   : > { %2148 = vmatpush.msra.mxu1 %v1947_v7  ;;  %v2203_v7 = vld [vmem:[#allocation16 + $0x2b0] sm:$0xff] }
 0x4b2   : > { %v1901_v29 = vld [vmem:[#allocation1 + $0x7] ss:$9 sm:$0xff]  ;;  %2065 = vmatpush.msra.mxu3 %v1999_v28 }
 0x4b3   : > { %1902 = vrot.lane.b32.xlu2 %v1901_v29, %s2846_s24  ;;  %1910 = vst [vmem:[#allocation1] sm:$0xff] %v3083_v24  ;;  %2149 = vmatpush.msra.mxu1 %v1946_v8  ;;  %v1972_v8 = vld [vmem:[#allocation16 + $0x128] sm:$0xff] }
 0x4b4   : > { %1911 = vst [vmem:[#allocation1 + $0x9] sm:$0xff] %v3080_v22  ;;  %v1730_v52 = vpop.permute.xlu0 %1729  ;;  %2066 = vmatpush.msra.mxu3 %v1998_v30  ;;  %v1960_v30 = vld [vmem:[#allocation16 + $0x100] sm:$0xff] }
 0x4b5   : > { %v1731_v4 = vrot.slane %v1730_v52, 7  ;;  %2150 = vmatpush.msra.mxu1 %v1945_v9  ;;  %v1941_v9 = vld [vmem:[#allocation16 + $0x68] sm:$0xff] }
 0x4b6   : > { %v1747_v53 = vpop.permute.xlu1 %1746  ;;  %2067 = vmatpush.msra.mxu3 %v1997_v32 }
 0x4b7   : > { %v1748_v54 = vrot.slane %v1747_v53, 7  ;;  %v1733_v55 = vsel %vm1732_vm2, %v1731_v4, %v1730_v52  ;;  %2151 = vmatpush.msra.mxu1 %v1944_v11  ;;  %v1990_v52 = vld [vmem:[#allocation16 + $0x1b8] sm:$0xff]  ;;  %v1971_v11 = vld [vmem:[#allocation16 + $0x120] sm:$0xff] }
 0x4b8   : > { %1740 = vst.msk [vmem:[#allocation5 + $0x1] ss:$8 sm:$0x7] %vm3123_vm3, %v1733_v55  ;;  %2068 = vmatpush.msra.mxu3 %v1996_v34  ;;  %v2006_v4 = vld [vmem:[#allocation16 + $0x238] sm:$0xff]  ;;  %v2005_v55 = vld [vmem:[#allocation16 + $0x230] sm:$0xff] }
 0x4b9   : > { %v1749_v56 = vsel %vm1732_vm2, %v1748_v54, %v1747_v53  ;;  %2097 = vmatpush.msrb.mxu0 %v2006_v4  ;;  %v1977_v53 = vld [vmem:[#allocation16 + $0x150] sm:$0xff] }
 0x4ba   : > { %1752 = vst.msk [vmem:[#allocation5 + $0x2] ss:$8 sm:$0x7] %vm3123_vm3, %v1749_v56  ;;  %2069 = vmatpush.msra.mxu3 %v1995_v37  ;;  %2048 = vmatpush.msrb.mxu2 %v1977_v53  ;;  %v1989_v54 = vld [vmem:[#allocation16 + $0x1b0] sm:$0xff]  ;;  %v1976_v56 = vld [vmem:[#allocation16 + $0x148] sm:$0xff] }
 0x4bb   : > { %v1913_v57 = vld [vmem:[#allocation1 + $0x7] ss:$9 sm:$0xff]  ;;  %2098 = vmatpush.msrb.mxu0 %v2005_v55 }
 0x4bc   : > { %1914 = vrot.lane.b32.xlu0 %v1913_v57, %s2846_s24  ;;  %v1795_v60 = vpop.permute.xlu2 %1794  ;;  %2070 = vmatpush.msra.mxu3 %v1994_v41  ;;  %v1934_v34 = vld [vmem:[#allocation16 + $0x30] sm:$0xff]  ;;  %v1933_v37 = vld [vmem:[#allocation16 + $0x28] sm:$0xff] }
 0x4bd   : > { %v1796_v61 = vrot.slane %v1795_v60, 7  ;;  %2049 = vmatpush.msrb.mxu2 %v1976_v56  ;;  %2099 = vmatpush.msrb.mxu0 %v2004_v59 }
 0x4be   : > { %2071 = vmatpush.msra.mxu3 %v1993_v44  ;;  %v1931_v44 = vld [vmem:[#allocation16 + $0x18] sm:$0xff] }
 0x4bf   : > { %v1797_v63 = vsel %vm1732_vm2, %v1796_v61, %v1795_v60  ;;  %v1975_v60 = vld [vmem:[#allocation16 + $0x140] sm:$0xff] }
 0x4c0   : > { %1800 = vst.msk [vmem:[#allocation5 + $0x6] ss:$8 sm:$0x7] %vm3123_vm3, %v1797_v63  ;;  %2072 = vmatpush.msra.mxu3 %v1992_v47  ;;  %v2003_v63 = vld [vmem:[#allocation16 + $0x220] sm:$0xff]  ;;  %2050 = vmatpush.msrb.mxu2 %v1975_v60  ;;  %v1930_v47 = vld [vmem:[#allocation16 + $0x10] sm:$0xff] }
 0x4c1   : > { %2100 = vmatpush.msrb.mxu0 %v2003_v63  ;;  %v2220_v63 = vld [vmem:[#allocation16 + $0x338] sm:$0xff] }
 0x4c2   : > { %v1771_v2 = vpop.permute.xlu0 %1770  ;;  %2073 = vmatpush.msra.mxu3 %v1991_v50  ;;  %2051 = vmatpush.msrb.mxu2 %v1974_v0  ;;  %v2190_v50 = vld [vmem:[#allocation16 + $0x248] sm:$0xff] }
 0x4c3   : > { %v1772_v3 = vrot.slane %v1771_v2, 7  ;;  %2113 = vmatpush.msra.mxu0 %v1943_v1 }
 0x4c4   : > { %2074 = vmatpush.msra.mxu3 %v1990_v52  ;;  %2052 = vmatpush.msrb.mxu2 %v1973_v5  ;;  %v2218_v5 = vld [vmem:[#allocation16 + $0x328] sm:$0xff] }
 0x4c5   : > { %v1773_v6 = vsel %vm1732_vm2, %v1772_v3, %v1771_v2  ;;  %v2204_v3 = vld [vmem:[#allocation16 + $0x2b8] sm:$0xff] }
 0x4c6   : > { %1776 = vst.msk [vmem:[#allocation5 + $0x4] ss:$8 sm:$0x7] %vm3123_vm3, %v1773_v6  ;;  %2075 = vmatpush.msra.mxu3 %v1989_v54  ;;  %v1942_v6 = vld [vmem:[#allocation16 + $0x70] sm:$0xff]  ;;  %2053 = vmatpush.msrb.mxu2 %v1972_v8 }
 0x4c7   : > { %2114 = vmatpush.msra.mxu0 %v1942_v6 }
 0x4c8   : > { %2076 = vmatpush.msra.mxu3 %v1988_v58  ;;  %2054 = vmatpush.msrb.mxu2 %v1971_v11  ;;  %v2222_v11 = vld [vmem:[#allocation16 + $0x348] sm:$0xff] }
 0x4c9   : > { %2115 = vmatpush.msra.mxu0 %v1941_v9  ;;  %v2217_v9 = vld [vmem:[#allocation16 + $0x320] sm:$0xff] }
 0x4ca   : > { %2077 = vmatpush.msra.mxu3 %v1987_v62 }
 0x4cb   : > { %v1783_v10 = vpop.permute.xlu1 %1782 }
 0x4cc   : > { %v1784_v12 = vrot.slane %v1783_v10, 7  ;;  %2254 = vmatpush.msrb.mxu3 %v2204_v3  ;;  %v2219_v3 = vld [vmem:[#allocation16 + $0x330] sm:$0xff] }
 0x4ce   : > { %v1785_v13 = vsel %vm1732_vm2, %v1784_v12, %v1783_v10  ;;  %v2202_v10 = vld [vmem:[#allocation16 + $0x2a8] sm:$0xff]  ;;  %2255 = vmatpush.msrb.mxu3 %v2203_v7  ;;  %v1940_v12 = vld [vmem:[#allocation16 + $0x60] sm:$0xff]  ;;  %v2224_v7 = vld [vmem:[#allocation16 + $0x358] sm:$0xff] }
 0x4cf   : > { %1788 = vst.msk [vmem:[#allocation5 + $0x5] ss:$8 sm:$0x7] %vm3123_vm3, %v1785_v13  ;;  %v2201_v13 = vld [vmem:[#allocation16 + $0x2a0] sm:$0xff]  ;;  %2116 = vmatpush.msra.mxu0 %v1940_v12 }
 0x4d0   : > { %2256 = vmatpush.msrb.mxu3 %v2202_v10  ;;  %v2223_v10 = vld [vmem:[#allocation16 + $0x350] sm:$0xff] }
 0x4d2   : > { %2257 = vmatpush.msrb.mxu3 %v2201_v13  ;;  %v2216_v13 = vld [vmem:[#allocation16 + $0x318] sm:$0xff] }
 0x4d7   : > { %v1831_v14 = vpop.permute.xlu2 %1830 }
 0x4d8   : > { %v1832_v15 = vrot.slane %v1831_v14, 7 }
 0x4da   : > { %v1833_v16 = vsel %vm1732_vm2, %v1832_v15, %v1831_v14  ;;  %v1939_v14 = vld [vmem:[#allocation16 + $0x58] sm:$0xff] }
 0x4db   : > { %1836 = vst.msk [vmem:[#allocation5 + $0x19] ss:$8 sm:$0x7] %vm3123_vm3, %v1833_v16  ;;  %v2200_v15 = vld [vmem:[#allocation16 + $0x298] sm:$0xff]  ;;  %2117 = vmatpush.msra.mxu0 %v1939_v14  ;;  %v2221_v14 = vld [vmem:[#allocation16 + $0x340] sm:$0xff] }
 0x4dc   : > { %2258 = vmatpush.msrb.mxu3 %v2200_v15  ;;  %v2215_v15 = vld [vmem:[#allocation16 + $0x310] sm:$0xff] }
 0x4dd   : > { %v1807_v17 = vpop.permute.xlu0 %1806 }
 0x4de   : > { %v1808_v18 = vrot.slane %v1807_v17, 7  ;;  %2259 = vmatpush.msrb.mxu3 %v2199_v20 }
 0x4e0   : > { %v1809_v19 = vsel %vm1732_vm2, %v1808_v18, %v1807_v17  ;;  %v1963_v18 = vld [vmem:[#allocation16 + $0x118] sm:$0xff] }
 0x4e1   : > { %1812 = vst.msk [vmem:[#allocation5 + $0x7] ss:$8 sm:$0x7] %vm3123_vm3, %v1809_v19  ;;  %2171 = vmatpush.msra.mxu2 %v1963_v18  ;;  %v1938_v19 = vld [vmem:[#allocation16 + $0x50] sm:$0xff]  ;;  %v2212_v18 = vld [vmem:[#allocation16 + $0x2f8] sm:$0xff] }
 0x4e2   : > { %2118 = vmatpush.msra.mxu0 %v1938_v19 }
 0x4e4   : > { %2119 = vmatpush.msra.mxu0 %v1937_v23 }
 0x4e6   : > { %v1819_v22 = vpop.permute.xlu1 %1818 }
 0x4e7   : > { %v1820_v24 = vrot.slane %v1819_v22, 7 }
 0x4e8   : > { %v1923_v26 = vld [vmem:[#allocation5 + $0x8] sm:$0xff]  ;;  %v1964_v52 = vld [vmem:[#allocation5] sm:$0xfe]  ;;  %v1966_v53 = vld [vmem:[#allocation5 + $0x10] sm:$0xfe] }
 0x4e9   : > { %v1821_v27 = vsel %vm1732_vm2, %v1820_v24, %v1819_v22  ;;  %2152 = vmatmul.f32.vlgmr.msra.gmra.mxu1 %v1923_v26  ;;  %v1962_v22 = vld [vmem:[#allocation16 + $0x110] sm:$0xff]  ;;  %v2198_v24 = vld [vmem:[#allocation16 + $0x288] sm:$0xff]  ;;  %v1936_v26 = vld [vmem:[#allocation16 + $0x40] sm:$0xff]  ;;  %v2016_v56 = vrot.slane %v1964_v52, 1 }
 0x4ea   : > { %1824 = vst.msk [vmem:[#allocation5 + $0x18] ss:$8 sm:$0x7] %vm3123_vm3, %v1821_v27  ;;  %2172 = vmatpush.msra.mxu2 %v1962_v22  ;;  %v2197_v27 = vld [vmem:[#allocation16 + $0x280] sm:$0xff]  ;;  %2260 = vmatpush.msrb.mxu3 %v2198_v24 }
 0x4eb   : > { %2120 = vmatpush.msra.mxu0 %v1936_v26  ;;  %v1965_v4 = vld [vmem:[#allocation5 + $0x8] sm:$0xfe] }
 0x4ec   : > { %2173 = vmatpush.msra.mxu2 %v1961_v25  ;;  %2261 = vmatpush.msrb.mxu3 %v2197_v27 }
 0x4ed   : > { %2121 = vmatpush.msra.mxu0 %v1935_v31  ;;  %v2209_v31 = vld [vmem:[#allocation16 + $0x2e0] sm:$0xff] }
 0x4ee   : > { %2174 = vmatpush.msra.mxu2 %v1960_v30  ;;  %2262 = vmatpush.msrb.mxu3 %v2196_v33  ;;  %v2182_v30 = vld [vmem:[#allocation5] sm:$0xfc] }
 0x4ef   : > { %2122 = vmatpush.msra.mxu0 %v1934_v34  ;;  %v2208_v33 = vld [vmem:[#allocation16 + $0x2d8] sm:$0xff]  ;;  %v2231_v34 = vrot.slane %v2182_v30, 2 }
 0x4f1   : > { %2123 = vmatpush.msra.mxu0 %v1933_v37 }
 0x4f2   : > { %v1867_v36 = vpop.permute.xlu2 %1866 }
 0x4f3   : > { %v1868_v38 = vrot.slane %v1867_v36, 7  ;;  %2124 = vmatpush.msra.mxu0 %v1932_v39 }
 0x4f5   : > { %v1869_v40 = vsel %vm1732_vm2, %v1868_v38, %v1867_v36  ;;  %v2195_v36 = vld [vmem:[#allocation16 + $0x270] sm:$0xff]  ;;  %v2194_v38 = vld [vmem:[#allocation16 + $0x268] sm:$0xff]  ;;  %2125 = vmatpush.msra.mxu0 %v1931_v44 }
 0x4f6   : > { %1872 = vst.msk [vmem:[#allocation5 + $0x1c] ss:$8 sm:$0x7] %vm3123_vm3, %v1869_v40  ;;  %2263 = vmatpush.msrb.mxu3 %v2195_v36  ;;  %v2193_v40 = vld [vmem:[#allocation16 + $0x260] sm:$0xff] }
 0x4f7   : > { %2126 = vmatpush.msra.mxu0 %v1930_v47  ;;  %v1924_v36 = vld [vmem:[#allocation5 + $0x10] sm:$0xff] }
 0x4f8   : > { %v1843_v46 = vpop.permute.xlu0 %1842  ;;  %2264 = vmatpush.msrb.mxu3 %v2194_v38  ;;  %v1922_v38 = vld [vmem:[#allocation5] sm:$0xff]  ;;  %v2184_v47 = vld [vmem:[#allocation5 + $0x10] sm:$0xfc] }
 0x4f9   : > { %v1844_v48 = vrot.slane %v1843_v46, 7  ;;  %2127 = vmatpush.msra.mxu0 %v1929_v49 }
 0x4fa   : > { %2265 = vmatpush.msrb.mxu3 %v2193_v40  ;;  %v2206_v40 = vld [vmem:[#allocation16 + $0x2c8] sm:$0xff] }
 0x4fb   : > { %v1845_v29 = vsel %vm1732_vm2, %v1844_v48, %v1843_v46  ;;  %v2191_v48 = vld [vmem:[#allocation16 + $0x250] sm:$0xff] }
 0x4fc   : > { %1848 = vst.msk [vmem:[#allocation5 + $0x1a] ss:$8 sm:$0x7] %vm3123_vm3, %v1845_v29  ;;  %2266 = vmatpush.msrb.mxu3 %v2192_v45  ;;  %v1928_v29 = vld [vmem:[#allocation16] sm:$0xff] }
 0x4fd   : > { %2128 = vmatpush.msra.mxu0 %v1928_v29  ;;  %v2183_v45 = vld [vmem:[#allocation5 + $0x8] sm:$0xfc] }
 0x4fe   : > { %2267 = vmatpush.msrb.mxu3 %v2191_v48  ;;  %v2234_v49 = vrot.slane %v2183_v45, 2 }
 0x500   : > { %2268 = vmatpush.msrb.mxu3 %v2190_v50  ;;  %v2237_v50 = vrot.slane %v2184_v47, 2 }
 0x501   : > { %v1855_v57 = vpop.permute.xlu1 %1854 }
 0x502   : > { %v1856_v61 = vrot.slane %v1855_v57, 7  ;;  %2269 = vmatpush.msrb.mxu3 %v2189_v51 }
 0x504   : > { %v1857_v2 = vsel %vm1732_vm2, %v1856_v61, %v1855_v57  ;;  %v2019_v57 = vrot.slane %v1965_v4, 1  ;;  %v2022_v61 = vrot.slane %v1966_v53, 1 }
 0x505   : > { %1860 = vst.msk [vmem:[#allocation5 + $0x1b] ss:$8 sm:$0x7] %vm3123_vm3, %v1857_v2 }
 0x50d   : > { %v1903_v16 = vpop.permute.xlu2 %1902 }
 0x50e   : > { %v1904_v17 = vrot.slane %v1903_v16, 7 }
 0x510   : > { %v1905_v21 = vsel %vm1732_vm2, %v1904_v17, %v1903_v16  ;;  %v2214_v16 = vld [vmem:[#allocation16 + $0x308] sm:$0xff]  ;;  %v2213_v17 = vld [vmem:[#allocation16 + $0x300] sm:$0xff] }
 0x511   : > { %1908 = vst.msk [vmem:[#allocation5 + $0x1f] ss:$8 sm:$0x7] %vm3123_vm3, %v1905_v21 }
 0x513   : > { %v1879_v28 = vpop.permute.xlu0 %1878 }
 0x514   : > { %v1880_v32 = vrot.slane %v1879_v28, 7 }
 0x516   : > { %v1881_v35 = vsel %vm1732_vm2, %v1880_v32, %v1879_v28  ;;  %v2210_v28 = vld [vmem:[#allocation16 + $0x2e8] sm:$0xff] }
 0x517   : > { %1884 = vst.msk [vmem:[#allocation5 + $0x1d] ss:$8 sm:$0x7] %vm3123_vm3, %v1881_v35  ;;  %v2207_v35 = vld [vmem:[#allocation16 + $0x2d0] sm:$0xff] }
 0x51c   : > { %v1891_v41 = vpop.permute.xlu1 %1890 }
 0x51d   : > { %v1892_v43 = vrot.slane %v1891_v41, 7 }
 0x51f   : > { %v1893_v46 = vsel %vm1732_vm2, %v1892_v43, %v1891_v41  ;;  %v2205_v41 = vld [vmem:[#allocation16 + $0x2c0] sm:$0xff] }
 0x520   : > { %1896 = vst.msk [vmem:[#allocation5 + $0x1e] ss:$8 sm:$0x7] %vm3123_vm3, %v1893_v46 }
 0x527   : > { %v3179_v54 = vld [vmem:[#allocation5 + $0x20] sm:$0xff]  ;;  %v3181_v55 = vld [vmem:[#allocation5 + $0x18] sm:$0xff]  ;;  %v3183_v58 = vld [vmem:[#allocation5 + $0x28] sm:$0xff] }
 0x528   : > { %v2020_v59 = vrot.slane %v3179_v54, 1  ;;  %2155 = vmatmul.f32.gmra.mxu1 %v3179_v54  ;;  %v2017_v60 = vrot.slane %v3181_v55, 1  ;;  %v2023_v62 = vrot.slane %v3183_v58, 1  ;;  %v2232_v32 = vrot.slane %v3181_v55, 2 }
 0x529   : > { %v2235_v46 = vrot.slane %v3179_v54, 2  ;;  %v2238_v48 = vrot.slane %v3183_v58, 2 }
 0x52a   : > { %v2018_v0 = vsel %vm1101_vm13, %v2016_v56, %v2017_v60  ;;  %v2021_v1 = vsel %vm1101_vm13, %v2019_v57, %v2020_v59  ;;  %v2024_v2 = vsel %vm1101_vm13, %v2022_v61, %v2023_v62  ;;  %v2233_v37 = vsel %vm1523_vm14, %v2231_v34, %v2232_v32 }
 0x52b   : > { %2055 = vmatmul.f32.vlgmr.msrb.gmra.mxu2 %v2018_v0  ;;  %2078 = vmatmul.f32.vlgmr.msra.gmra.mxu3 %v2021_v1  ;;  %v2236_v29 = vsel %vm1523_vm14, %v2234_v49, %v2235_v46  ;;  %v2239_v51 = vsel %vm1523_vm14, %v2237_v50, %v2238_v48 }
 0x52c   : > { %2498 = vmatmul.msk.f32.vlgmr.msrb.gmra.mxu0 %vm875_vm9, %v2024_v2  ;;  %2277 = vmatpush.msrb.mxu2 %v2220_v63 }
 0x52d   : > { %2312 = vmatpush.msrb.mxu0 %v2224_v7 }
 0x52e   : > { %v1915_v6 = vpop.permute.xlu0 %1914  ;;  %2278 = vmatpush.msrb.mxu2 %v2219_v3 }
 0x52f   : > { %v1916_v8 = vrot.slane %v1915_v6, 7  ;;  %2313 = vmatpush.msrb.mxu0 %v2223_v10 }
 0x530   : > { %2279 = vmatpush.msrb.mxu2 %v2218_v5 }
 0x531   : > { %v1917_v12 = vsel %vm1732_vm2, %v1916_v8, %v1915_v6  ;;  %2314 = vmatpush.msrb.mxu0 %v2222_v11 }
 0x532   : > { %1920 = vst.msk [vmem:[#allocation5 + $0x30] ss:$8 sm:$0x7] %vm3123_vm3, %v1917_v12  ;;  %2280 = vmatpush.msrb.mxu2 %v2217_v9 }
 0x533   : > { %2315 = vmatpush.msrb.mxu0 %v2221_v14 }
 0x534   : > { %2281 = vmatpush.msrb.mxu2 %v2216_v13 }
 0x536   : > { %2282 = vmatpush.msrb.mxu2 %v2215_v15 }
 0x538   : > { %2283 = vmatpush.msrb.mxu2 %v2214_v16 }
 0x539   : > { %v1967_v19 = vld [vmem:[#allocation5 + $0x30] sm:$0x1]  ;;  %v1968_v20 = vld [vmem:[#allocation5 + $0x38] sm:$0x1]  ;;  %v1969_v21 = vld [vmem:[#allocation5 + $0x40] sm:$0x1] }
 0x53a   : > { %v2025_v22 = vrot.slane %v1967_v19, 1  ;;  %v2027_v23 = vrot.slane %v1968_v20, 1  ;;  %v2029_v24 = vrot.slane %v1969_v21, 1  ;;  %2284 = vmatpush.msrb.mxu2 %v2213_v17  ;;  %v2185_v39 = vld [vmem:[#allocation5 + $0x30] sm:$0x3] }
 0x53b   : > { %v2240_v43 = vrot.slane %v2185_v39, 2  ;;  %v2186_v52 = vld [vmem:[#allocation5 + $0x38] sm:$0x3]  ;;  %v2187_v4 = vld [vmem:[#allocation5 + $0x40] sm:$0x3] }
 0x53c   : > { %v2026_v25 = vsel %vm1101_vm13, %v2017_v60, %v2025_v22  ;;  %v2028_v26 = vsel %vm1101_vm13, %v2020_v59, %v2027_v23  ;;  %v2030_v27 = vsel %vm1101_vm13, %v2023_v62, %v2029_v24  ;;  %2285 = vmatpush.msrb.mxu2 %v2212_v18  ;;  %v2242_v53 = vrot.slane %v2186_v52, 2  ;;  %v2597_v17 = vld [vmem:[%s3237_s10] ss:$0 sm:$0xff] }
 0x53d   : > { %2058 = vmatmul.f32.gmra.mxu2 %v2026_v25  ;;  %2081 = vmatmul.f32.gmra.mxu3 %v2028_v26  ;;  %v2241_v44 = vsel %vm1523_vm14, %v2232_v32, %v2240_v43  ;;  %v2244_v56 = vrot.slane %v2187_v4, 2 }
 0x53e   : > { %2499 = vmatmul.msk.f32.gmra.mxu0 %vm875_vm9, %v2030_v27  ;;  %2286 = vmatpush.msrb.mxu2 %v2211_v42 }
 0x53f   : > { %v2245_v54 = vsel %vm1523_vm14, %v2238_v48, %v2244_v56 }
 0x540   : > { %2287 = vmatpush.msrb.mxu2 %v2210_v28 }
 0x542   : > { %2288 = vmatpush.msrb.mxu2 %v2209_v31 }
 0x544   : > { %2289 = vmatpush.msrb.mxu2 %v2208_v33 }
 0x545   : > { %2500 = vmatmul.msk.f32.vlgmr.msra.gmra.mxu2 %vm875_vm9, %v1924_v36  ;;  %2270 = vmatmul.f32.vlgmr.msrb.gmra.mxu3 %v2233_v37 }
 0x546   : > { %2129 = vmatmul.f32.vlgmr.msra.gmra.mxu0 %v1922_v38  ;;  %2290 = vmatpush.msrb.mxu2 %v2207_v35 }
 0x548   : > { %2291 = vmatpush.msrb.mxu2 %v2206_v40 }
 0x54a   : > { %2292 = vmatpush.msrb.mxu2 %v2205_v41 }
 0x54d   : > { %2501 = vmatmul.msk.f32.gmra.mxu2 %vm875_vm9, %v3183_v58  ;;  %2273 = vmatmul.f32.gmra.mxu3 %v2241_v44 }
 0x54e   : > { %2132 = vmatmul.f32.gmra.mxu0 %v3181_v55  ;;  %v2243_v55 = vsel %vm1523_vm14, %v2235_v46, %v2242_v53 }
 0x555   : > { %2293 = vmatmul.f32.vlgmr.msrb.gmra.mxu2 %v2236_v29 }
 0x556   : > { %2502 = vmatmul.msk.f32.vlgmr.msrb.gmra.mxu0 %vm875_vm9, %v2239_v51 }
 0x55d   : > { %2296 = vmatmul.f32.gmra.mxu2 %v2243_v55 }
 0x55e   : > { %2503 = vmatmul.msk.f32.gmra.mxu0 %vm875_vm9, %v2245_v54 }
 0x566   : > { %v2153_v8 = vpop.f32.mrf.mxu1 }
 0x5a5   : > { %v2156_v20 = vpop.f32.mrf.mxu1 }
 0x5a9   : > { %v2102_v57 = vpop.f32.mrf.mxu0 }
 0x5ae   : > { %v2056_v58 = vpop.f32.mrf.mxu2  ;;  %v2079_v61 = vpop.f32.mrf.mxu3 }
 0x5af   : > { %v2080_v2 = vadd.f32 %v2079_v61, %v2056_v58 }
 0x5b1   : > { %v2103_v5 = vadd.f32 %v2102_v57, %v2080_v2 }
 0x5bb   : > { %v2105_v59 = vpop.f32.mrf.mxu0 }
 0x5c0   : > { %v2059_v60 = vpop.f32.mrf.mxu2  ;;  %v2082_v0 = vpop.f32.mrf.mxu3 }
 0x5c1   : > { %v2083_v9 = vadd.f32 %v2082_v0, %v2059_v60 }
 0x5c3   : > { %v2130_v62 = vpop.f32.mrf.mxu0  ;;  %v2106_v15 = vadd.f32 %v2105_v59, %v2083_v9 }
 0x5c4   : > { %v2131_v6 = vadd.f32 %v2130_v62, %v2103_v5 }
 0x5c6   : > { %v2154_v12 = vadd.f32 %v2153_v8, %v2131_v6 }
 0x5c8   : > { %v2176_v63 = vpop.f32.mrf.mxu2  ;;  %v2271_v7 = vpop.f32.mrf.mxu3 }
 0x5c9   : > { %v2177_v14 = vadd.f32 %v2176_v63, %v2154_v12 }
 0x5cb   : > { %v2133_v1 = vpop.f32.mrf.mxu0 }
 0x5cc   : > { %v2134_v18 = vadd.f32 %v2133_v1, %v2106_v15 }
 0x5ce   : > { %v2157_v24 = vadd.f32 %v2156_v20, %v2134_v18 }
 0x5d0   : > { %v2179_v3 = vpop.f32.mrf.mxu2  ;;  %v2274_v22 = vpop.f32.mrf.mxu3 }
 0x5d1   : > { %v2180_v26 = vadd.f32 %v2179_v3, %v2157_v24 }
 0x5d3   : > { %v2317_v10 = vpop.f32.mrf.mxu0 }
 0x5d8   : > { %v2294_v11 = vpop.f32.mrf.mxu2 }
 0x5d9   : > { %v2295_v13 = vadd.f32 %v2294_v11, %v2271_v7 }
 0x5db   : > { %v2318_v16 = vadd.f32 %v2317_v10, %v2295_v13  ;;  %v2320_v25 = vpop.f32.mrf.mxu0 }
 0x5dd   : > { %v2323_v19 = vadd.f32 %v2318_v16, %v2177_v14 }
 0x5df   : > { %v2329_v21 = vadd.f32 %v2597_v17, %v2323_v19 }
 0x5e0   : > { %v2297_v23 = vpop.f32.mrf.mxu2 }
 0x5e1   : > { %2331 = vst.msk [vmem:[%s490_s13] sm:$0xff] %vm553_vm4, %v2329_v21  ;;  %v2298_v42 = vadd.f32 %v2297_v23, %v2274_v22 }
 0x5e3   : > { %v2321_v27 = vadd.f32 %v2320_v25, %v2298_v42 }
 0x5e5   : > { %v2324_v28 = vadd.f32 %v2321_v27, %v2180_v26 }
 0x5e7   : > { %v2330_v30 = vadd.f32 %v2597_v17, %v2324_v28 }
 0x5e9   : > { %2332 = vst.msk [vmem:[%s490_s13 + $0x8] sm:$0xff] %vm553_vm4, %v2330_v30 }
 0x5ea PF: > { %s25_s17 = sadd.s32 1, %s2830_s17  }
 0x5eb   : > { %p22_p7 = scmp.ge.s32.totalorder %s25_s17, 4  }
 0x5ed   :  { %24 = sbr.rel (!%p22_p7) target bundleno = 6 (0x6), region = 161 }
 0x5f2   :  { %2354 = vsyncpa [#allocation7], 1 }
 0x5f3   :  { %2356 = vsyncpa [#allocation7 + $0x1], 1 }
 0x5f4   :  { %2357 = vsyncpa [#allocation9], 1 }
 0x5f5   :  { %2358 = vsyncpa [#allocation12], 1 }
 0x5f6   :  { %2359 = vsyncpa [#allocation15], 1 }

</bundles_post_ra>
